<compile_context>
chip_gen: v7x
topology: tpu7x:2x2x1
jax: 0.10.0
libtpu: 0.0.40
codegen_flags: <defaults>
</compile_context>

<pallas_src>
import jax
import jax.numpy as jnp
import numpy as np
from jax import lax
from jax.experimental import pallas as pl
from jax.experimental.pallas import tpu as pltpu

LN_EPS = 1e-5  # nn.LayerNorm default eps


def _first_layer_kernel(x_ref, wx_ref, wh_ref, consts_ref, init_ref,
                        out_ref, hx_ref, cx_ref):
    # x_ref:      (T_BLK*Bb, I)  input slab, rows ordered (t_local, b_local)
    # wx_ref:     (I, 4O)        input -> gates weights
    # wh_ref:     (O, 4O)        hidden -> gates weights
    # consts_ref: (3, 4O)        [bias ; ln_weight ; ln_bias]
    # init_ref:   (2, O)         [init_hx ; init_cx]
    # out_ref:    (T_BLK*Bb, O)  output slab
    # hx_ref/cx_ref: (Bb, O)     VMEM scratch = recurrent carry (persists over time blocks)
    ti = pl.program_id(1)               # time-block index (innermost, sequential)
    Bb, O = hx_ref.shape
    T_BLK = x_ref.shape[0] // Bb

    @pl.when(ti == 0)
    def _():
        hx_ref[...] = jnp.broadcast_to(init_ref[0:1, :], (Bb, O))
        cx_ref[...] = jnp.broadcast_to(init_ref[1:2, :], (Bb, O))

    bias = consts_ref[0:1, :]           # (1, 4O)
    ln_w = consts_ref[1:2, :]
    ln_b = consts_ref[2:3, :]
    wh = wh_ref[...]                    # (O, 4O), resident

    # Hoisted time-independent projection for the whole time block:
    # one (T_BLK*Bb, I) @ (I, 4O) matmul instead of T_BLK tiny ones.
    zx = jnp.dot(x_ref[...], wx_ref[...],
                 preferred_element_type=jnp.float32) + bias   # (T_BLK*Bb, 4O)

    hx = hx_ref[...]
    cx = cx_ref[...]

    # Recurrent part: only hx @ Wh + zx[t] per step.  T_BLK is a static Python
    # int, so this fully unrolls with static slices / stores only.
    for t in range(T_BLK):
        z = zx[t * Bb:(t + 1) * Bb, :] + jnp.dot(
            hx, wh, preferred_element_type=jnp.float32)       # (Bb, 4O)

        # LayerNorm over the flat 4*O gate axis == PyTorch LayerNorm((4, O)).
        mean = jnp.mean(z, axis=-1, keepdims=True)
        var = jnp.mean(jnp.square(z - mean), axis=-1, keepdims=True)
        zn = (z - mean) * lax.rsqrt(var + LN_EPS)
        zn = zn * ln_w + ln_b

        ig = jax.nn.sigmoid(zn[:, 0 * O:1 * O])
        fg = jax.nn.sigmoid(zn[:, 1 * O:2 * O])
        og = jax.nn.sigmoid(zn[:, 2 * O:3 * O])
        hidden = jnp.tanh(zn[:, 3 * O:4 * O])

        cx = fg * cx + ig * hidden
        hx = og * cx                    # RNMT cell: no tanh on the cell state.
        out_ref[t * Bb:(t + 1) * Bb, :] = hx.astype(out_ref.dtype)

    hx_ref[...] = hx
    cx_ref[...] = cx


def _largest_divisor_leq(n, pref):
    for c in range(min(pref, n), 0, -1):
        if n % c == 0:
            return c
    return 1


def first_layer_forward(x, Wx, Wh, b, ln_w, ln_b, init_hx, init_cx,
                        *, t_blk=8, b_blk=None):
    """x: (B, S, I) batch-major (PyTorch convention). Returns (B, S, O)."""
    B, S, I = x.shape
    O = init_hx.shape[-1]

    t_blk = _largest_divisor_leq(S, t_blk)
    b_blk = B if b_blk is None else _largest_divisor_leq(B, b_blk)
    # Splitting the batch across grid blocks (for v7x megacore) requires
    # sublane-aligned batch blocks; otherwise keep the whole batch per block.
    if b_blk != B and b_blk % 8 != 0:
        b_blk = B
    n_t = S // t_blk
    n_b = B // b_blk

    # Re-layout x into per-(batch-block, time-block) 2D slabs so the kernel
    # sees plain 2D operands: rows within a slab are ordered (t_local, b_local).
    #   (B, S, I) -> (n_b, n_t, t_blk*b_blk, I)
    x_r = x.reshape(n_b, b_blk, n_t, t_blk, I)
    x_r = jnp.transpose(x_r, (0, 2, 3, 1, 4)).reshape(n_b, n_t, t_blk * b_blk, I)

    consts = jnp.concatenate([b, ln_w, ln_b], axis=0)      # (3, 4O)
    init = jnp.concatenate([init_hx, init_cx], axis=0)     # (2, O)

    out_r = pl.pallas_call(
        _first_layer_kernel,
        out_shape=jax.ShapeDtypeStruct((n_b, n_t, t_blk * b_blk, O), x.dtype),
        grid_spec=pltpu.PrefetchScalarGridSpec(
            num_scalar_prefetch=0,
            grid=(n_b, n_t),            # time axis innermost (the recurrence)
            in_specs=[
                pl.BlockSpec((None, None, t_blk * b_blk, I),
                             lambda bi, ti: (bi, ti, 0, 0)),   # x slab
                pl.BlockSpec((I, 4 * O), lambda bi, ti: (0, 0)),   # Wx (resident)
                pl.BlockSpec((O, 4 * O), lambda bi, ti: (0, 0)),   # Wh (resident)
                pl.BlockSpec((3, 4 * O), lambda bi, ti: (0, 0)),   # b / ln_w / ln_b
                pl.BlockSpec((2, O), lambda bi, ti: (0, 0)),       # init_hx / init_cx
            ],
            out_specs=pl.BlockSpec((None, None, t_blk * b_blk, O),
                                   lambda bi, ti: (bi, ti, 0, 0)),
            scratch_shapes=[
                pltpu.VMEM((b_blk, O), jnp.float32),   # hx carry
                pltpu.VMEM((b_blk, O), jnp.float32),   # cx carry
            ],
        ),
        compiler_params=pltpu.CompilerParams(
            # batch blocks are independent (v7x megacore); time is sequential.
            dimension_semantics=("parallel", "arbitrary")),
    )(x_r, Wx, Wh, consts, init)

    # Undo the slab layout: (n_b, n_t, t_blk*b_blk, O) -> (B, S, O)
    out = out_r.reshape(n_b, n_t, t_blk, b_blk, O)
    out = jnp.transpose(out, (0, 3, 1, 2, 4)).reshape(B, S, O)
    return out


def first_layer_reference(x, Wx, Wh, b, ln_w, ln_b, init_hx, init_cx):
    """Pure-JAX reference of FirstLayer.forward(inputo, states=None)."""
    B, S, I = x.shape
    O = init_hx.shape[-1]
    hx = jnp.broadcast_to(init_hx, (B, O))
    cx = jnp.broadcast_to(init_cx, (B, O))
    outs = []
    for t in range(S):
        z = x[:, t] @ Wx + hx @ Wh + b
        mean = z.mean(-1, keepdims=True)
        var = ((z - mean) ** 2).mean(-1, keepdims=True)
        zn = (z - mean) / jnp.sqrt(var + LN_EPS) * ln_w + ln_b
        ig = jax.nn.sigmoid(zn[:, 0 * O:1 * O])
        fg = jax.nn.sigmoid(zn[:, 1 * O:2 * O])
        og = jax.nn.sigmoid(zn[:, 2 * O:3 * O])
        hidden = jnp.tanh(zn[:, 3 * O:4 * O])
        cx = fg * cx + ig * hidden
        hx = og * cx
        outs.append(hx)
    return jnp.stack(outs, axis=1)


if __name__ == "__main__":
    # isize=osize=32 (osize defaults to isize); B=4, S=16 exercises two time
    # blocks (t_blk=8) and the carry across grid steps.
    B, S, I, O = 4, 16, 32, 32

    key = jax.random.PRNGKey(0)
    k_x, k_wx, k_wh, k_b, k_lw, k_lb, k_h, k_c = jax.random.split(key, 8)

    x = jax.random.normal(k_x, (B, S, I), dtype=jnp.float32)

    # LSTMCell4RNMT params: Linear(I+O -> 4*O) split as Wx/Wh; LayerNorm((4,O)) flattened.
    scale = 1.0 / jnp.sqrt(jnp.float32(I + O))
    Wx = scale * jax.random.normal(k_wx, (I, 4 * O), dtype=jnp.float32)
    Wh = scale * jax.random.normal(k_wh, (O, 4 * O), dtype=jnp.float32)
    b = 0.1 * jax.random.normal(k_b, (1, 4 * O), dtype=jnp.float32)
    ln_w = 1.0 + 0.1 * jax.random.normal(k_lw, (1, 4 * O), dtype=jnp.float32)
    ln_b = 0.1 * jax.random.normal(k_lb, (1, 4 * O), dtype=jnp.float32)
    # FirstLayer init_hx/init_cx are zero-initialized learned nn.Parameters;
    # use small nonzero values to exercise the broadcast path.
    init_hx = 0.1 * jax.random.normal(k_h, (1, O), dtype=jnp.float32)
    init_cx = 0.1 * jax.random.normal(k_c, (1, O), dtype=jnp.float32)

    # dropout=0.0 -> no dropout layer (no-op), matching the module default.
    # TODO(synk): single-step decode branch (states is not None) not implemented here.

    out = first_layer_forward(x, Wx, Wh, b, ln_w, ln_b, init_hx, init_cx, t_blk=8)
    out = jax.block_until_ready(out)

    ref = first_layer_reference(x, Wx, Wh, b, ln_w, ln_b, init_hx, init_cx)
    np.testing.assert_allclose(np.asarray(out), np.asarray(ref),
                               rtol=1e-3, atol=1e-3)

    print("KERNEL_OK")
</pallas_src>

<mosaic_0001>
module attributes {stable_mosaic.version = 11 : i64} {
  func.func @_first_layer_kernel(%arg0: i32, %arg1: i32, %arg2: memref<1x1x32x32xf32, #tpu.memory_space<vmem>>, %arg3: memref<32x128xf32, #tpu.memory_space<vmem>>, %arg4: memref<32x128xf32, #tpu.memory_space<vmem>>, %arg5: memref<3x128xf32, #tpu.memory_space<vmem>>, %arg6: memref<2x32xf32, #tpu.memory_space<vmem>>, %arg7: memref<1x1x32x32xf32, #tpu.memory_space<vmem>>, %arg8: memref<4x32xf32, #tpu.memory_space<vmem>>, %arg9: memref<4x32xf32, #tpu.memory_space<vmem>>) attributes {dimension_semantics = [#tpu.dimension_semantics<parallel>, #tpu.dimension_semantics<arbitrary>], iteration_bounds = array<i64: 1, 2>, scalar_prefetch = 0 : i64, scratch_operands = 2 : i64, tpu.core_type = #tpu.core_type<tc>, window_params = [{transform_indices = @transform_0, window_bounds = array<i64: 1, 1, 32, 32>}, {pipeline_mode = #tpu.pipeline_mode<synchronous>, transform_indices = @transform_1, window_bounds = array<i64: 32, 128>}, {pipeline_mode = #tpu.pipeline_mode<synchronous>, transform_indices = @transform_2, window_bounds = array<i64: 32, 128>}, {pipeline_mode = #tpu.pipeline_mode<synchronous>, transform_indices = @transform_3, window_bounds = array<i64: 3, 128>}, {pipeline_mode = #tpu.pipeline_mode<synchronous>, transform_indices = @transform_4, window_bounds = array<i64: 2, 32>}, {transform_indices = @transform_5, window_bounds = array<i64: 1, 1, 32, 32>}]} {
    %c0_i32 = arith.constant 0 : i32
    %0 = arith.cmpi eq, %arg1, %c0_i32 : i32
    %1 = arith.extui %0 : i1 to i32
    %c0_i32_0 = arith.constant 0 : i32
    %2 = arith.cmpi ne, %1, %c0_i32_0 : i32
    scf.if %2 {
      %c0_117 = arith.constant 0 : index
      %c0_118 = arith.constant 0 : index
      %433 = vector.load %arg6[%c0_117, %c0_118] : memref<2x32xf32, #tpu.memory_space<vmem>>, vector<1x32xf32>
      %434 = vector.shape_cast %433 : vector<1x32xf32> to vector<1x32xf32>
      %435 = vector.broadcast %434 : vector<1x32xf32> to vector<4x32xf32>
      %c0_119 = arith.constant 0 : index
      %c0_120 = arith.constant 0 : index
      %436 = vector.load %arg8[%c0_119, %c0_120] : memref<4x32xf32, #tpu.memory_space<vmem>>, vector<4x32xf32>
      tpu.vector_store %arg8[%c0_119, %c0_120], %435 {strides = array<i32>} : memref<4x32xf32, #tpu.memory_space<vmem>>, vector<4x32xf32>,
      %c1_121 = arith.constant 1 : index
      %c0_122 = arith.constant 0 : index
      %437 = vector.load %arg6[%c1_121, %c0_122] : memref<2x32xf32, #tpu.memory_space<vmem>>, vector<1x32xf32>
      %438 = vector.shape_cast %437 : vector<1x32xf32> to vector<1x32xf32>
      %439 = vector.broadcast %438 : vector<1x32xf32> to vector<4x32xf32>
      %c0_123 = arith.constant 0 : index
      %c0_124 = arith.constant 0 : index
      %440 = vector.load %arg9[%c0_123, %c0_124] : memref<4x32xf32, #tpu.memory_space<vmem>>, vector<4x32xf32>
      tpu.vector_store %arg9[%c0_123, %c0_124], %439 {strides = array<i32>} : memref<4x32xf32, #tpu.memory_space<vmem>>, vector<4x32xf32>,
    } else {
    }
    %c0 = arith.constant 0 : index
    %c0_1 = arith.constant 0 : index
    %3 = vector.load %arg5[%c0, %c0_1] : memref<3x128xf32, #tpu.memory_space<vmem>>, vector<1x128xf32>
    %c1 = arith.constant 1 : index
    %c0_2 = arith.constant 0 : index
    %4 = vector.load %arg5[%c1, %c0_2] : memref<3x128xf32, #tpu.memory_space<vmem>>, vector<1x128xf32>
    %c2 = arith.constant 2 : index
    %c0_3 = arith.constant 0 : index
    %5 = vector.load %arg5[%c2, %c0_3] : memref<3x128xf32, #tpu.memory_space<vmem>>, vector<1x128xf32>
    %c0_4 = arith.constant 0 : index
    %c0_5 = arith.constant 0 : index
    %6 = vector.load %arg4[%c0_4, %c0_5] : memref<32x128xf32, #tpu.memory_space<vmem>>, vector<32x128xf32>
    %c0_6 = arith.constant 0 : index
    %c0_7 = arith.constant 0 : index
    %c0_8 = arith.constant 0 : index
    %c0_9 = arith.constant 0 : index
    %7 = vector.load %arg2[%c0_6, %c0_7, %c0_8, %c0_9] : memref<1x1x32x32xf32, #tpu.memory_space<vmem>>, vector<1x1x32x32xf32>
    %8 = vector.shape_cast %7 : vector<1x1x32x32xf32> to vector<32x32xf32>
    %c0_10 = arith.constant 0 : index
    %c0_11 = arith.constant 0 : index
    %9 = vector.load %arg3[%c0_10, %c0_11] : memref<32x128xf32, #tpu.memory_space<vmem>>, vector<32x128xf32>
    %cst = arith.constant dense<0.000000e+00> : vector<32x128xf32>
    %10 = tpu.matmul %8, %9, %cst {dimension_numbers = #tpu.dot_dimension_numbers<[1], [0], [0], [1], [0, 0, 1, 1], [], []>} : vector<32x32xf32>, vector<32x128xf32>, vector<32x128xf32> -> vector<32x128xf32>
    %11 = vector.broadcast %3 : vector<1x128xf32> to vector<32x128xf32>
    %12 = arith.addf %10, %11 : vector<32x128xf32>
    %c0_12 = arith.constant 0 : index
    %c0_13 = arith.constant 0 : index
    %13 = vector.load %arg8[%c0_12, %c0_13] : memref<4x32xf32, #tpu.memory_space<vmem>>, vector<4x32xf32>
    %c0_14 = arith.constant 0 : index
    %c0_15 = arith.constant 0 : index
    %14 = vector.load %arg9[%c0_14, %c0_15] : memref<4x32xf32, #tpu.memory_space<vmem>>, vector<4x32xf32>
    %15 = vector.extract_strided_slice %12 {offsets = [0, 0], sizes = [4, 128], strides = [1, 1]} : vector<32x128xf32> to vector<4x128xf32>
    %cst_16 = arith.constant dense<0.000000e+00> : vector<4x128xf32>
    %16 = tpu.matmul %13, %6, %cst_16 {dimension_numbers = #tpu.dot_dimension_numbers<[1], [0], [0], [1], [0, 0, 1, 1], [], []>} : vector<4x32xf32>, vector<32x128xf32>, vector<4x128xf32> -> vector<4x128xf32>
    %17 = arith.addf %15, %16 : vector<4x128xf32>
    %cst_17 = arith.constant dense<0.000000e+00> : vector<4xf32>
    %18 = vector.multi_reduction <add>, %17, %cst_17 [1] : vector<4x128xf32> to vector<4xf32>
    %19 = vector.shape_cast %18 : vector<4xf32> to vector<4x1xf32>
    %cst_18 = arith.constant 1.280000e+02 : f32
    %20 = vector.broadcast %cst_18 : f32 to vector<4x1xf32>
    %21 = arith.divf %19, %20 : vector<4x1xf32>
    %22 = vector.broadcast %21 : vector<4x1xf32> to vector<4x128xf32>
    %23 = arith.subf %17, %22 : vector<4x128xf32>
    %24 = arith.mulf %23, %23 : vector<4x128xf32>
    %cst_19 = arith.constant dense<0.000000e+00> : vector<4xf32>
    %25 = vector.multi_reduction <add>, %24, %cst_19 [1] : vector<4x128xf32> to vector<4xf32>
    %26 = vector.shape_cast %25 : vector<4xf32> to vector<4x1xf32>
    %cst_20 = arith.constant 1.280000e+02 : f32
    %27 = vector.broadcast %cst_20 : f32 to vector<4x1xf32>
    %28 = arith.divf %26, %27 : vector<4x1xf32>
    %29 = vector.broadcast %21 : vector<4x1xf32> to vector<4x128xf32>
    %30 = arith.subf %17, %29 : vector<4x128xf32>
    %cst_21 = arith.constant 9.99999974E-6 : f32
    %31 = vector.broadcast %cst_21 : f32 to vector<4x1xf32>
    %32 = arith.addf %28, %31 : vector<4x1xf32>
    %33 = math.rsqrt %32 : vector<4x1xf32>
    %34 = vector.broadcast %33 : vector<4x1xf32> to vector<4x128xf32>
    %35 = arith.mulf %30, %34 : vector<4x128xf32>
    %36 = vector.broadcast %4 : vector<1x128xf32> to vector<4x128xf32>
    %37 = arith.mulf %35, %36 : vector<4x128xf32>
    %38 = vector.broadcast %5 : vector<1x128xf32> to vector<4x128xf32>
    %39 = arith.addf %37, %38 : vector<4x128xf32>
    %40 = vector.extract_strided_slice %39 {offsets = [0, 0], sizes = [4, 32], strides = [1, 1]} : vector<4x128xf32> to vector<4x32xf32>
    %41 = arith.negf %40 : vector<4x32xf32>
    %42 = math.exp %41 : vector<4x32xf32>
    %cst_22 = arith.constant 1.000000e+00 : f32
    %43 = vector.broadcast %cst_22 : f32 to vector<4x32xf32>
    %44 = arith.addf %43, %42 : vector<4x32xf32>
    %45 = arith.divf %43, %44 : vector<4x32xf32>
    %46 = vector.extract_strided_slice %39 {offsets = [0, 32], sizes = [4, 32], strides = [1, 1]} : vector<4x128xf32> to vector<4x32xf32>
    %47 = arith.negf %46 : vector<4x32xf32>
    %48 = math.exp %47 : vector<4x32xf32>
    %cst_23 = arith.constant 1.000000e+00 : f32
    %49 = vector.broadcast %cst_23 : f32 to vector<4x32xf32>
    %50 = arith.addf %49, %48 : vector<4x32xf32>
    %51 = arith.divf %49, %50 : vector<4x32xf32>
    %52 = vector.extract_strided_slice %39 {offsets = [0, 64], sizes = [4, 32], strides = [1, 1]} : vector<4x128xf32> to vector<4x32xf32>
    %53 = arith.negf %52 : vector<4x32xf32>
    %54 = math.exp %53 : vector<4x32xf32>
    %cst_24 = arith.constant 1.000000e+00 : f32
    %55 = vector.broadcast %cst_24 : f32 to vector<4x32xf32>
    %56 = arith.addf %55, %54 : vector<4x32xf32>
    %57 = arith.divf %55, %56 : vector<4x32xf32>
    %58 = vector.extract_strided_slice %39 {offsets = [0, 96], sizes = [4, 32], strides = [1, 1]} : vector<4x128xf32> to vector<4x32xf32>
    %59 = math.tanh %58 : vector<4x32xf32>
    %60 = arith.mulf %51, %14 : vector<4x32xf32>
    %61 = arith.mulf %45, %59 : vector<4x32xf32>
    %62 = arith.addf %60, %61 : vector<4x32xf32>
    %63 = arith.mulf %57, %62 : vector<4x32xf32>
    %c0_25 = arith.constant 0 : index
    %c0_26 = arith.constant 0 : index
    %c0_27 = arith.constant 0 : index
    %c0_28 = arith.constant 0 : index
    %64 = vector.load %arg7[%c0_25, %c0_26, %c0_27, %c0_28] : memref<1x1x32x32xf32, #tpu.memory_space<vmem>>, vector<1x1x4x32xf32>
    %65 = vector.shape_cast %64 : vector<1x1x4x32xf32> to vector<4x32xf32>
    %66 = vector.shape_cast %63 : vector<4x32xf32> to vector<1x1x4x32xf32>
    tpu.vector_store %arg7[%c0_25, %c0_26, %c0_27, %c0_28], %66 {strides = array<i32>} : memref<1x1x32x32xf32, #tpu.memory_space<vmem>>, vector<1x1x4x32xf32>,
    %67 = vector.extract_strided_slice %12 {offsets = [4, 0], sizes = [4, 128], strides = [1, 1]} : vector<32x128xf32> to vector<4x128xf32>
    %cst_29 = arith.constant dense<0.000000e+00> : vector<4x128xf32>
    %68 = tpu.matmul %63, %6, %cst_29 {dimension_numbers = #tpu.dot_dimension_numbers<[1], [0], [0], [1], [0, 0, 1, 1], [], []>} : vector<4x32xf32>, vector<32x128xf32>, vector<4x128xf32> -> vector<4x128xf32>
    %69 = arith.addf %67, %68 : vector<4x128xf32>
    %cst_30 = arith.constant dense<0.000000e+00> : vector<4xf32>
    %70 = vector.multi_reduction <add>, %69, %cst_30 [1] : vector<4x128xf32> to vector<4xf32>
    %71 = vector.shape_cast %70 : vector<4xf32> to vector<4x1xf32>
    %cst_31 = arith.constant 1.280000e+02 : f32
    %72 = vector.broadcast %cst_31 : f32 to vector<4x1xf32>
    %73 = arith.divf %71, %72 : vector<4x1xf32>
    %74 = vector.broadcast %73 : vector<4x1xf32> to vector<4x128xf32>
    %75 = arith.subf %69, %74 : vector<4x128xf32>
    %76 = arith.mulf %75, %75 : vector<4x128xf32>
    %cst_32 = arith.constant dense<0.000000e+00> : vector<4xf32>
    %77 = vector.multi_reduction <add>, %76, %cst_32 [1] : vector<4x128xf32> to vector<4xf32>
    %78 = vector.shape_cast %77 : vector<4xf32> to vector<4x1xf32>
    %cst_33 = arith.constant 1.280000e+02 : f32
    %79 = vector.broadcast %cst_33 : f32 to vector<4x1xf32>
    %80 = arith.divf %78, %79 : vector<4x1xf32>
    %81 = vector.broadcast %73 : vector<4x1xf32> to vector<4x128xf32>
    %82 = arith.subf %69, %81 : vector<4x128xf32>
    %cst_34 = arith.constant 9.99999974E-6 : f32
    %83 = vector.broadcast %cst_34 : f32 to vector<4x1xf32>
    %84 = arith.addf %80, %83 : vector<4x1xf32>
    %85 = math.rsqrt %84 : vector<4x1xf32>
    %86 = vector.broadcast %85 : vector<4x1xf32> to vector<4x128xf32>
    %87 = arith.mulf %82, %86 : vector<4x128xf32>
    %88 = vector.broadcast %4 : vector<1x128xf32> to vector<4x128xf32>
    %89 = arith.mulf %87, %88 : vector<4x128xf32>
    %90 = vector.broadcast %5 : vector<1x128xf32> to vector<4x128xf32>
    %91 = arith.addf %89, %90 : vector<4x128xf32>
    %92 = vector.extract_strided_slice %91 {offsets = [0, 0], sizes = [4, 32], strides = [1, 1]} : vector<4x128xf32> to vector<4x32xf32>
    %93 = arith.negf %92 : vector<4x32xf32>
    %94 = math.exp %93 : vector<4x32xf32>
    %cst_35 = arith.constant 1.000000e+00 : f32
    %95 = vector.broadcast %cst_35 : f32 to vector<4x32xf32>
    %96 = arith.addf %95, %94 : vector<4x32xf32>
    %97 = arith.divf %95, %96 : vector<4x32xf32>
    %98 = vector.extract_strided_slice %91 {offsets = [0, 32], sizes = [4, 32], strides = [1, 1]} : vector<4x128xf32> to vector<4x32xf32>
    %99 = arith.negf %98 : vector<4x32xf32>
    %100 = math.exp %99 : vector<4x32xf32>
    %cst_36 = arith.constant 1.000000e+00 : f32
    %101 = vector.broadcast %cst_36 : f32 to vector<4x32xf32>
    %102 = arith.addf %101, %100 : vector<4x32xf32>
    %103 = arith.divf %101, %102 : vector<4x32xf32>
    %104 = vector.extract_strided_slice %91 {offsets = [0, 64], sizes = [4, 32], strides = [1, 1]} : vector<4x128xf32> to vector<4x32xf32>
    %105 = arith.negf %104 : vector<4x32xf32>
    %106 = math.exp %105 : vector<4x32xf32>
    %cst_37 = arith.constant 1.000000e+00 : f32
    %107 = vector.broadcast %cst_37 : f32 to vector<4x32xf32>
    %108 = arith.addf %107, %106 : vector<4x32xf32>
    %109 = arith.divf %107, %108 : vector<4x32xf32>
    %110 = vector.extract_strided_slice %91 {offsets = [0, 96], sizes = [4, 32], strides = [1, 1]} : vector<4x128xf32> to vector<4x32xf32>
    %111 = math.tanh %110 : vector<4x32xf32>
    %112 = arith.mulf %103, %62 : vector<4x32xf32>
    %113 = arith.mulf %97, %111 : vector<4x32xf32>
    %114 = arith.addf %112, %113 : vector<4x32xf32>
    %115 = arith.mulf %109, %114 : vector<4x32xf32>
    %c0_38 = arith.constant 0 : index
    %c0_39 = arith.constant 0 : index
    %c4 = arith.constant 4 : index
    %c0_40 = arith.constant 0 : index
    %116 = vector.load %arg7[%c0_38, %c0_39, %c4, %c0_40] : memref<1x1x32x32xf32, #tpu.memory_space<vmem>>, vector<1x1x4x32xf32>
    %117 = vector.shape_cast %116 : vector<1x1x4x32xf32> to vector<4x32xf32>
    %118 = vector.shape_cast %115 : vector<4x32xf32> to vector<1x1x4x32xf32>
    tpu.vector_store %arg7[%c0_38, %c0_39, %c4, %c0_40], %118 {strides = array<i32>} : memref<1x1x32x32xf32, #tpu.memory_space<vmem>>, vector<1x1x4x32xf32>,
    %119 = vector.extract_strided_slice %12 {offsets = [8, 0], sizes = [4, 128], strides = [1, 1]} : vector<32x128xf32> to vector<4x128xf32>
    %cst_41 = arith.constant dense<0.000000e+00> : vector<4x128xf32>
    %120 = tpu.matmul %115, %6, %cst_41 {dimension_numbers = #tpu.dot_dimension_numbers<[1], [0], [0], [1], [0, 0, 1, 1], [], []>} : vector<4x32xf32>, vector<32x128xf32>, vector<4x128xf32> -> vector<4x128xf32>
    %121 = arith.addf %119, %120 : vector<4x128xf32>
    %cst_42 = arith.constant dense<0.000000e+00> : vector<4xf32>
    %122 = vector.multi_reduction <add>, %121, %cst_42 [1] : vector<4x128xf32> to vector<4xf32>
    %123 = vector.shape_cast %122 : vector<4xf32> to vector<4x1xf32>
    %cst_43 = arith.constant 1.280000e+02 : f32
    %124 = vector.broadcast %cst_43 : f32 to vector<4x1xf32>
    %125 = arith.divf %123, %124 : vector<4x1xf32>
    %126 = vector.broadcast %125 : vector<4x1xf32> to vector<4x128xf32>
    %127 = arith.subf %121, %126 : vector<4x128xf32>
    %128 = arith.mulf %127, %127 : vector<4x128xf32>
    %cst_44 = arith.constant dense<0.000000e+00> : vector<4xf32>
    %129 = vector.multi_reduction <add>, %128, %cst_44 [1] : vector<4x128xf32> to vector<4xf32>
    %130 = vector.shape_cast %129 : vector<4xf32> to vector<4x1xf32>
    %cst_45 = arith.constant 1.280000e+02 : f32
    %131 = vector.broadcast %cst_45 : f32 to vector<4x1xf32>
    %132 = arith.divf %130, %131 : vector<4x1xf32>
    %133 = vector.broadcast %125 : vector<4x1xf32> to vector<4x128xf32>
    %134 = arith.subf %121, %133 : vector<4x128xf32>
    %cst_46 = arith.constant 9.99999974E-6 : f32
    %135 = vector.broadcast %cst_46 : f32 to vector<4x1xf32>
    %136 = arith.addf %132, %135 : vector<4x1xf32>
    %137 = math.rsqrt %136 : vector<4x1xf32>
    %138 = vector.broadcast %137 : vector<4x1xf32> to vector<4x128xf32>
    %139 = arith.mulf %134, %138 : vector<4x128xf32>
    %140 = vector.broadcast %4 : vector<1x128xf32> to vector<4x128xf32>
    %141 = arith.mulf %139, %140 : vector<4x128xf32>
    %142 = vector.broadcast %5 : vector<1x128xf32> to vector<4x128xf32>
    %143 = arith.addf %141, %142 : vector<4x128xf32>
    %144 = vector.extract_strided_slice %143 {offsets = [0, 0], sizes = [4, 32], strides = [1, 1]} : vector<4x128xf32> to vector<4x32xf32>
    %145 = arith.negf %144 : vector<4x32xf32>
    %146 = math.exp %145 : vector<4x32xf32>
    %cst_47 = arith.constant 1.000000e+00 : f32
    %147 = vector.broadcast %cst_47 : f32 to vector<4x32xf32>
    %148 = arith.addf %147, %146 : vector<4x32xf32>
    %149 = arith.divf %147, %148 : vector<4x32xf32>
    %150 = vector.extract_strided_slice %143 {offsets = [0, 32], sizes = [4, 32], strides = [1, 1]} : vector<4x128xf32> to vector<4x32xf32>
    %151 = arith.negf %150 : vector<4x32xf32>
    %152 = math.exp %151 : vector<4x32xf32>
    %cst_48 = arith.constant 1.000000e+00 : f32
    %153 = vector.broadcast %cst_48 : f32 to vector<4x32xf32>
    %154 = arith.addf %153, %152 : vector<4x32xf32>
    %155 = arith.divf %153, %154 : vector<4x32xf32>
    %156 = vector.extract_strided_slice %143 {offsets = [0, 64], sizes = [4, 32], strides = [1, 1]} : vector<4x128xf32> to vector<4x32xf32>
    %157 = arith.negf %156 : vector<4x32xf32>
    %158 = math.exp %157 : vector<4x32xf32>
    %cst_49 = arith.constant 1.000000e+00 : f32
    %159 = vector.broadcast %cst_49 : f32 to vector<4x32xf32>
    %160 = arith.addf %159, %158 : vector<4x32xf32>
    %161 = arith.divf %159, %160 : vector<4x32xf32>
    %162 = vector.extract_strided_slice %143 {offsets = [0, 96], sizes = [4, 32], strides = [1, 1]} : vector<4x128xf32> to vector<4x32xf32>
    %163 = math.tanh %162 : vector<4x32xf32>
    %164 = arith.mulf %155, %114 : vector<4x32xf32>
    %165 = arith.mulf %149, %163 : vector<4x32xf32>
    %166 = arith.addf %164, %165 : vector<4x32xf32>
    %167 = arith.mulf %161, %166 : vector<4x32xf32>
    %c0_50 = arith.constant 0 : index
    %c0_51 = arith.constant 0 : index
    %c8 = arith.constant 8 : index
    %c0_52 = arith.constant 0 : index
    %168 = vector.load %arg7[%c0_50, %c0_51, %c8, %c0_52] : memref<1x1x32x32xf32, #tpu.memory_space<vmem>>, vector<1x1x4x32xf32>
    %169 = vector.shape_cast %168 : vector<1x1x4x32xf32> to vector<4x32xf32>
    %170 = vector.shape_cast %167 : vector<4x32xf32> to vector<1x1x4x32xf32>
    tpu.vector_store %arg7[%c0_50, %c0_51, %c8, %c0_52], %170 {strides = array<i32>} : memref<1x1x32x32xf32, #tpu.memory_space<vmem>>, vector<1x1x4x32xf32>,
    %171 = vector.extract_strided_slice %12 {offsets = [12, 0], sizes = [4, 128], strides = [1, 1]} : vector<32x128xf32> to vector<4x128xf32>
    %cst_53 = arith.constant dense<0.000000e+00> : vector<4x128xf32>
    %172 = tpu.matmul %167, %6, %cst_53 {dimension_numbers = #tpu.dot_dimension_numbers<[1], [0], [0], [1], [0, 0, 1, 1], [], []>} : vector<4x32xf32>, vector<32x128xf32>, vector<4x128xf32> -> vector<4x128xf32>
    %173 = arith.addf %171, %172 : vector<4x128xf32>
    %cst_54 = arith.constant dense<0.000000e+00> : vector<4xf32>
    %174 = vector.multi_reduction <add>, %173, %cst_54 [1] : vector<4x128xf32> to vector<4xf32>
    %175 = vector.shape_cast %174 : vector<4xf32> to vector<4x1xf32>
    %cst_55 = arith.constant 1.280000e+02 : f32
    %176 = vector.broadcast %cst_55 : f32 to vector<4x1xf32>
    %177 = arith.divf %175, %176 : vector<4x1xf32>
    %178 = vector.broadcast %177 : vector<4x1xf32> to vector<4x128xf32>
    %179 = arith.subf %173, %178 : vector<4x128xf32>
    %180 = arith.mulf %179, %179 : vector<4x128xf32>
    %cst_56 = arith.constant dense<0.000000e+00> : vector<4xf32>
    %181 = vector.multi_reduction <add>, %180, %cst_56 [1] : vector<4x128xf32> to vector<4xf32>
    %182 = vector.shape_cast %181 : vector<4xf32> to vector<4x1xf32>
    %cst_57 = arith.constant 1.280000e+02 : f32
    %183 = vector.broadcast %cst_57 : f32 to vector<4x1xf32>
    %184 = arith.divf %182, %183 : vector<4x1xf32>
    %185 = vector.broadcast %177 : vector<4x1xf32> to vector<4x128xf32>
    %186 = arith.subf %173, %185 : vector<4x128xf32>
    %cst_58 = arith.constant 9.99999974E-6 : f32
    %187 = vector.broadcast %cst_58 : f32 to vector<4x1xf32>
    %188 = arith.addf %184, %187 : vector<4x1xf32>
    %189 = math.rsqrt %188 : vector<4x1xf32>
    %190 = vector.broadcast %189 : vector<4x1xf32> to vector<4x128xf32>
    %191 = arith.mulf %186, %190 : vector<4x128xf32>
    %192 = vector.broadcast %4 : vector<1x128xf32> to vector<4x128xf32>
    %193 = arith.mulf %191, %192 : vector<4x128xf32>
    %194 = vector.broadcast %5 : vector<1x128xf32> to vector<4x128xf32>
    %195 = arith.addf %193, %194 : vector<4x128xf32>
    %196 = vector.extract_strided_slice %195 {offsets = [0, 0], sizes = [4, 32], strides = [1, 1]} : vector<4x128xf32> to vector<4x32xf32>
    %197 = arith.negf %196 : vector<4x32xf32>
    %198 = math.exp %197 : vector<4x32xf32>
    %cst_59 = arith.constant 1.000000e+00 : f32
    %199 = vector.broadcast %cst_59 : f32 to vector<4x32xf32>
    %200 = arith.addf %199, %198 : vector<4x32xf32>
    %201 = arith.divf %199, %200 : vector<4x32xf32>
    %202 = vector.extract_strided_slice %195 {offsets = [0, 32], sizes = [4, 32], strides = [1, 1]} : vector<4x128xf32> to vector<4x32xf32>
    %203 = arith.negf %202 : vector<4x32xf32>
    %204 = math.exp %203 : vector<4x32xf32>
    %cst_60 = arith.constant 1.000000e+00 : f32
    %205 = vector.broadcast %cst_60 : f32 to vector<4x32xf32>
    %206 = arith.addf %205, %204 : vector<4x32xf32>
    %207 = arith.divf %205, %206 : vector<4x32xf32>
    %208 = vector.extract_strided_slice %195 {offsets = [0, 64], sizes = [4, 32], strides = [1, 1]} : vector<4x128xf32> to vector<4x32xf32>
    %209 = arith.negf %208 : vector<4x32xf32>
    %210 = math.exp %209 : vector<4x32xf32>
    %cst_61 = arith.constant 1.000000e+00 : f32
    %211 = vector.broadcast %cst_61 : f32 to vector<4x32xf32>
    %212 = arith.addf %211, %210 : vector<4x32xf32>
    %213 = arith.divf %211, %212 : vector<4x32xf32>
    %214 = vector.extract_strided_slice %195 {offsets = [0, 96], sizes = [4, 32], strides = [1, 1]} : vector<4x128xf32> to vector<4x32xf32>
    %215 = math.tanh %214 : vector<4x32xf32>
    %216 = arith.mulf %207, %166 : vector<4x32xf32>
    %217 = arith.mulf %201, %215 : vector<4x32xf32>
    %218 = arith.addf %216, %217 : vector<4x32xf32>
    %219 = arith.mulf %213, %218 : vector<4x32xf32>
    %c0_62 = arith.constant 0 : index
    %c0_63 = arith.constant 0 : index
    %c12 = arith.constant 12 : index
    %c0_64 = arith.constant 0 : index
    %220 = vector.load %arg7[%c0_62, %c0_63, %c12, %c0_64] : memref<1x1x32x32xf32, #tpu.memory_space<vmem>>, vector<1x1x4x32xf32>
    %221 = vector.shape_cast %220 : vector<1x1x4x32xf32> to vector<4x32xf32>
    %222 = vector.shape_cast %219 : vector<4x32xf32> to vector<1x1x4x32xf32>
    tpu.vector_store %arg7[%c0_62, %c0_63, %c12, %c0_64], %222 {strides = array<i32>} : memref<1x1x32x32xf32, #tpu.memory_space<vmem>>, vector<1x1x4x32xf32>,
    %223 = vector.extract_strided_slice %12 {offsets = [16, 0], sizes = [4, 128], strides = [1, 1]} : vector<32x128xf32> to vector<4x128xf32>
    %cst_65 = arith.constant dense<0.000000e+00> : vector<4x128xf32>
    %224 = tpu.matmul %219, %6, %cst_65 {dimension_numbers = #tpu.dot_dimension_numbers<[1], [0], [0], [1], [0, 0, 1, 1], [], []>} : vector<4x32xf32>, vector<32x128xf32>, vector<4x128xf32> -> vector<4x128xf32>
    %225 = arith.addf %223, %224 : vector<4x128xf32>
    %cst_66 = arith.constant dense<0.000000e+00> : vector<4xf32>
    %226 = vector.multi_reduction <add>, %225, %cst_66 [1] : vector<4x128xf32> to vector<4xf32>
    %227 = vector.shape_cast %226 : vector<4xf32> to vector<4x1xf32>
    %cst_67 = arith.constant 1.280000e+02 : f32
    %228 = vector.broadcast %cst_67 : f32 to vector<4x1xf32>
    %229 = arith.divf %227, %228 : vector<4x1xf32>
    %230 = vector.broadcast %229 : vector<4x1xf32> to vector<4x128xf32>
    %231 = arith.subf %225, %230 : vector<4x128xf32>
    %232 = arith.mulf %231, %231 : vector<4x128xf32>
    %cst_68 = arith.constant dense<0.000000e+00> : vector<4xf32>
    %233 = vector.multi_reduction <add>, %232, %cst_68 [1] : vector<4x128xf32> to vector<4xf32>
    %234 = vector.shape_cast %233 : vector<4xf32> to vector<4x1xf32>
    %cst_69 = arith.constant 1.280000e+02 : f32
    %235 = vector.broadcast %cst_69 : f32 to vector<4x1xf32>
    %236 = arith.divf %234, %235 : vector<4x1xf32>
    %237 = vector.broadcast %229 : vector<4x1xf32> to vector<4x128xf32>
    %238 = arith.subf %225, %237 : vector<4x128xf32>
    %cst_70 = arith.constant 9.99999974E-6 : f32
    %239 = vector.broadcast %cst_70 : f32 to vector<4x1xf32>
    %240 = arith.addf %236, %239 : vector<4x1xf32>
    %241 = math.rsqrt %240 : vector<4x1xf32>
    %242 = vector.broadcast %241 : vector<4x1xf32> to vector<4x128xf32>
    %243 = arith.mulf %238, %242 : vector<4x128xf32>
    %244 = vector.broadcast %4 : vector<1x128xf32> to vector<4x128xf32>
    %245 = arith.mulf %243, %244 : vector<4x128xf32>
    %246 = vector.broadcast %5 : vector<1x128xf32> to vector<4x128xf32>
    %247 = arith.addf %245, %246 : vector<4x128xf32>
    %248 = vector.extract_strided_slice %247 {offsets = [0, 0], sizes = [4, 32], strides = [1, 1]} : vector<4x128xf32> to vector<4x32xf32>
    %249 = arith.negf %248 : vector<4x32xf32>
    %250 = math.exp %249 : vector<4x32xf32>
    %cst_71 = arith.constant 1.000000e+00 : f32
    %251 = vector.broadcast %cst_71 : f32 to vector<4x32xf32>
    %252 = arith.addf %251, %250 : vector<4x32xf32>
    %253 = arith.divf %251, %252 : vector<4x32xf32>
    %254 = vector.extract_strided_slice %247 {offsets = [0, 32], sizes = [4, 32], strides = [1, 1]} : vector<4x128xf32> to vector<4x32xf32>
    %255 = arith.negf %254 : vector<4x32xf32>
    %256 = math.exp %255 : vector<4x32xf32>
    %cst_72 = arith.constant 1.000000e+00 : f32
    %257 = vector.broadcast %cst_72 : f32 to vector<4x32xf32>
    %258 = arith.addf %257, %256 : vector<4x32xf32>
    %259 = arith.divf %257, %258 : vector<4x32xf32>
    %260 = vector.extract_strided_slice %247 {offsets = [0, 64], sizes = [4, 32], strides = [1, 1]} : vector<4x128xf32> to vector<4x32xf32>
    %261 = arith.negf %260 : vector<4x32xf32>
    %262 = math.exp %261 : vector<4x32xf32>
    %cst_73 = arith.constant 1.000000e+00 : f32
    %263 = vector.broadcast %cst_73 : f32 to vector<4x32xf32>
    %264 = arith.addf %263, %262 : vector<4x32xf32>
    %265 = arith.divf %263, %264 : vector<4x32xf32>
    %266 = vector.extract_strided_slice %247 {offsets = [0, 96], sizes = [4, 32], strides = [1, 1]} : vector<4x128xf32> to vector<4x32xf32>
    %267 = math.tanh %266 : vector<4x32xf32>
    %268 = arith.mulf %259, %218 : vector<4x32xf32>
    %269 = arith.mulf %253, %267 : vector<4x32xf32>
    %270 = arith.addf %268, %269 : vector<4x32xf32>
    %271 = arith.mulf %265, %270 : vector<4x32xf32>
    %c0_74 = arith.constant 0 : index
    %c0_75 = arith.constant 0 : index
    %c16 = arith.constant 16 : index
    %c0_76 = arith.constant 0 : index
    %272 = vector.load %arg7[%c0_74, %c0_75, %c16, %c0_76] : memref<1x1x32x32xf32, #tpu.memory_space<vmem>>, vector<1x1x4x32xf32>
    %273 = vector.shape_cast %272 : vector<1x1x4x32xf32> to vector<4x32xf32>
    %274 = vector.shape_cast %271 : vector<4x32xf32> to vector<1x1x4x32xf32>
    tpu.vector_store %arg7[%c0_74, %c0_75, %c16, %c0_76], %274 {strides = array<i32>} : memref<1x1x32x32xf32, #tpu.memory_space<vmem>>, vector<1x1x4x32xf32>,
    %275 = vector.extract_strided_slice %12 {offsets = [20, 0], sizes = [4, 128], strides = [1, 1]} : vector<32x128xf32> to vector<4x128xf32>
    %cst_77 = arith.constant dense<0.000000e+00> : vector<4x128xf32>
    %276 = tpu.matmul %271, %6, %cst_77 {dimension_numbers = #tpu.dot_dimension_numbers<[1], [0], [0], [1], [0, 0, 1, 1], [], []>} : vector<4x32xf32>, vector<32x128xf32>, vector<4x128xf32> -> vector<4x128xf32>
    %277 = arith.addf %275, %276 : vector<4x128xf32>
    %cst_78 = arith.constant dense<0.000000e+00> : vector<4xf32>
    %278 = vector.multi_reduction <add>, %277, %cst_78 [1] : vector<4x128xf32> to vector<4xf32>
    %279 = vector.shape_cast %278 : vector<4xf32> to vector<4x1xf32>
    %cst_79 = arith.constant 1.280000e+02 : f32
    %280 = vector.broadcast %cst_79 : f32 to vector<4x1xf32>
    %281 = arith.divf %279, %280 : vector<4x1xf32>
    %282 = vector.broadcast %281 : vector<4x1xf32> to vector<4x128xf32>
    %283 = arith.subf %277, %282 : vector<4x128xf32>
    %284 = arith.mulf %283, %283 : vector<4x128xf32>
    %cst_80 = arith.constant dense<0.000000e+00> : vector<4xf32>
    %285 = vector.multi_reduction <add>, %284, %cst_80 [1] : vector<4x128xf32> to vector<4xf32>
    %286 = vector.shape_cast %285 : vector<4xf32> to vector<4x1xf32>
    %cst_81 = arith.constant 1.280000e+02 : f32
    %287 = vector.broadcast %cst_81 : f32 to vector<4x1xf32>
    %288 = arith.divf %286, %287 : vector<4x1xf32>
    %289 = vector.broadcast %281 : vector<4x1xf32> to vector<4x128xf32>
    %290 = arith.subf %277, %289 : vector<4x128xf32>
    %cst_82 = arith.constant 9.99999974E-6 : f32
    %291 = vector.broadcast %cst_82 : f32 to vector<4x1xf32>
    %292 = arith.addf %288, %291 : vector<4x1xf32>
    %293 = math.rsqrt %292 : vector<4x1xf32>
    %294 = vector.broadcast %293 : vector<4x1xf32> to vector<4x128xf32>
    %295 = arith.mulf %290, %294 : vector<4x128xf32>
    %296 = vector.broadcast %4 : vector<1x128xf32> to vector<4x128xf32>
    %297 = arith.mulf %295, %296 : vector<4x128xf32>
    %298 = vector.broadcast %5 : vector<1x128xf32> to vector<4x128xf32>
    %299 = arith.addf %297, %298 : vector<4x128xf32>
    %300 = vector.extract_strided_slice %299 {offsets = [0, 0], sizes = [4, 32], strides = [1, 1]} : vector<4x128xf32> to vector<4x32xf32>
    %301 = arith.negf %300 : vector<4x32xf32>
    %302 = math.exp %301 : vector<4x32xf32>
    %cst_83 = arith.constant 1.000000e+00 : f32
    %303 = vector.broadcast %cst_83 : f32 to vector<4x32xf32>
    %304 = arith.addf %303, %302 : vector<4x32xf32>
    %305 = arith.divf %303, %304 : vector<4x32xf32>
    %306 = vector.extract_strided_slice %299 {offsets = [0, 32], sizes = [4, 32], strides = [1, 1]} : vector<4x128xf32> to vector<4x32xf32>
    %307 = arith.negf %306 : vector<4x32xf32>
    %308 = math.exp %307 : vector<4x32xf32>
    %cst_84 = arith.constant 1.000000e+00 : f32
    %309 = vector.broadcast %cst_84 : f32 to vector<4x32xf32>
    %310 = arith.addf %309, %308 : vector<4x32xf32>
    %311 = arith.divf %309, %310 : vector<4x32xf32>
    %312 = vector.extract_strided_slice %299 {offsets = [0, 64], sizes = [4, 32], strides = [1, 1]} : vector<4x128xf32> to vector<4x32xf32>
    %313 = arith.negf %312 : vector<4x32xf32>
    %314 = math.exp %313 : vector<4x32xf32>
    %cst_85 = arith.constant 1.000000e+00 : f32
    %315 = vector.broadcast %cst_85 : f32 to vector<4x32xf32>
    %316 = arith.addf %315, %314 : vector<4x32xf32>
    %317 = arith.divf %315, %316 : vector<4x32xf32>
    %318 = vector.extract_strided_slice %299 {offsets = [0, 96], sizes = [4, 32], strides = [1, 1]} : vector<4x128xf32> to vector<4x32xf32>
    %319 = math.tanh %318 : vector<4x32xf32>
    %320 = arith.mulf %311, %270 : vector<4x32xf32>
    %321 = arith.mulf %305, %319 : vector<4x32xf32>
    %322 = arith.addf %320, %321 : vector<4x32xf32>
    %323 = arith.mulf %317, %322 : vector<4x32xf32>
    %c0_86 = arith.constant 0 : index
    %c0_87 = arith.constant 0 : index
    %c20 = arith.constant 20 : index
    %c0_88 = arith.constant 0 : index
    %324 = vector.load %arg7[%c0_86, %c0_87, %c20, %c0_88] : memref<1x1x32x32xf32, #tpu.memory_space<vmem>>, vector<1x1x4x32xf32>
    %325 = vector.shape_cast %324 : vector<1x1x4x32xf32> to vector<4x32xf32>
    %326 = vector.shape_cast %323 : vector<4x32xf32> to vector<1x1x4x32xf32>
    tpu.vector_store %arg7[%c0_86, %c0_87, %c20, %c0_88], %326 {strides = array<i32>} : memref<1x1x32x32xf32, #tpu.memory_space<vmem>>, vector<1x1x4x32xf32>,
    %327 = vector.extract_strided_slice %12 {offsets = [24, 0], sizes = [4, 128], strides = [1, 1]} : vector<32x128xf32> to vector<4x128xf32>
    %cst_89 = arith.constant dense<0.000000e+00> : vector<4x128xf32>
    %328 = tpu.matmul %323, %6, %cst_89 {dimension_numbers = #tpu.dot_dimension_numbers<[1], [0], [0], [1], [0, 0, 1, 1], [], []>} : vector<4x32xf32>, vector<32x128xf32>, vector<4x128xf32> -> vector<4x128xf32>
    %329 = arith.addf %327, %328 : vector<4x128xf32>
    %cst_90 = arith.constant dense<0.000000e+00> : vector<4xf32>
    %330 = vector.multi_reduction <add>, %329, %cst_90 [1] : vector<4x128xf32> to vector<4xf32>
    %331 = vector.shape_cast %330 : vector<4xf32> to vector<4x1xf32>
    %cst_91 = arith.constant 1.280000e+02 : f32
    %332 = vector.broadcast %cst_91 : f32 to vector<4x1xf32>
    %333 = arith.divf %331, %332 : vector<4x1xf32>
    %334 = vector.broadcast %333 : vector<4x1xf32> to vector<4x128xf32>
    %335 = arith.subf %329, %334 : vector<4x128xf32>
    %336 = arith.mulf %335, %335 : vector<4x128xf32>
    %cst_92 = arith.constant dense<0.000000e+00> : vector<4xf32>
    %337 = vector.multi_reduction <add>, %336, %cst_92 [1] : vector<4x128xf32> to vector<4xf32>
    %338 = vector.shape_cast %337 : vector<4xf32> to vector<4x1xf32>
    %cst_93 = arith.constant 1.280000e+02 : f32
    %339 = vector.broadcast %cst_93 : f32 to vector<4x1xf32>
    %340 = arith.divf %338, %339 : vector<4x1xf32>
    %341 = vector.broadcast %333 : vector<4x1xf32> to vector<4x128xf32>
    %342 = arith.subf %329, %341 : vector<4x128xf32>
    %cst_94 = arith.constant 9.99999974E-6 : f32
    %343 = vector.broadcast %cst_94 : f32 to vector<4x1xf32>
    %344 = arith.addf %340, %343 : vector<4x1xf32>
    %345 = math.rsqrt %344 : vector<4x1xf32>
    %346 = vector.broadcast %345 : vector<4x1xf32> to vector<4x128xf32>
    %347 = arith.mulf %342, %346 : vector<4x128xf32>
    %348 = vector.broadcast %4 : vector<1x128xf32> to vector<4x128xf32>
    %349 = arith.mulf %347, %348 : vector<4x128xf32>
    %350 = vector.broadcast %5 : vector<1x128xf32> to vector<4x128xf32>
    %351 = arith.addf %349, %350 : vector<4x128xf32>
    %352 = vector.extract_strided_slice %351 {offsets = [0, 0], sizes = [4, 32], strides = [1, 1]} : vector<4x128xf32> to vector<4x32xf32>
    %353 = arith.negf %352 : vector<4x32xf32>
    %354 = math.exp %353 : vector<4x32xf32>
    %cst_95 = arith.constant 1.000000e+00 : f32
    %355 = vector.broadcast %cst_95 : f32 to vector<4x32xf32>
    %356 = arith.addf %355, %354 : vector<4x32xf32>
    %357 = arith.divf %355, %356 : vector<4x32xf32>
    %358 = vector.extract_strided_slice %351 {offsets = [0, 32], sizes = [4, 32], strides = [1, 1]} : vector<4x128xf32> to vector<4x32xf32>
    %359 = arith.negf %358 : vector<4x32xf32>
    %360 = math.exp %359 : vector<4x32xf32>
    %cst_96 = arith.constant 1.000000e+00 : f32
    %361 = vector.broadcast %cst_96 : f32 to vector<4x32xf32>
    %362 = arith.addf %361, %360 : vector<4x32xf32>
    %363 = arith.divf %361, %362 : vector<4x32xf32>
    %364 = vector.extract_strided_slice %351 {offsets = [0, 64], sizes = [4, 32], strides = [1, 1]} : vector<4x128xf32> to vector<4x32xf32>
    %365 = arith.negf %364 : vector<4x32xf32>
    %366 = math.exp %365 : vector<4x32xf32>
    %cst_97 = arith.constant 1.000000e+00 : f32
    %367 = vector.broadcast %cst_97 : f32 to vector<4x32xf32>
    %368 = arith.addf %367, %366 : vector<4x32xf32>
    %369 = arith.divf %367, %368 : vector<4x32xf32>
    %370 = vector.extract_strided_slice %351 {offsets = [0, 96], sizes = [4, 32], strides = [1, 1]} : vector<4x128xf32> to vector<4x32xf32>
    %371 = math.tanh %370 : vector<4x32xf32>
    %372 = arith.mulf %363, %322 : vector<4x32xf32>
    %373 = arith.mulf %357, %371 : vector<4x32xf32>
    %374 = arith.addf %372, %373 : vector<4x32xf32>
    %375 = arith.mulf %369, %374 : vector<4x32xf32>
    %c0_98 = arith.constant 0 : index
    %c0_99 = arith.constant 0 : index
    %c24 = arith.constant 24 : index
    %c0_100 = arith.constant 0 : index
    %376 = vector.load %arg7[%c0_98, %c0_99, %c24, %c0_100] : memref<1x1x32x32xf32, #tpu.memory_space<vmem>>, vector<1x1x4x32xf32>
    %377 = vector.shape_cast %376 : vector<1x1x4x32xf32> to vector<4x32xf32>
    %378 = vector.shape_cast %375 : vector<4x32xf32> to vector<1x1x4x32xf32>
    tpu.vector_store %arg7[%c0_98, %c0_99, %c24, %c0_100], %378 {strides = array<i32>} : memref<1x1x32x32xf32, #tpu.memory_space<vmem>>, vector<1x1x4x32xf32>,
    %379 = vector.extract_strided_slice %12 {offsets = [28, 0], sizes = [4, 128], strides = [1, 1]} : vector<32x128xf32> to vector<4x128xf32>
    %cst_101 = arith.constant dense<0.000000e+00> : vector<4x128xf32>
    %380 = tpu.matmul %375, %6, %cst_101 {dimension_numbers = #tpu.dot_dimension_numbers<[1], [0], [0], [1], [0, 0, 1, 1], [], []>} : vector<4x32xf32>, vector<32x128xf32>, vector<4x128xf32> -> vector<4x128xf32>
    %381 = arith.addf %379, %380 : vector<4x128xf32>
    %cst_102 = arith.constant dense<0.000000e+00> : vector<4xf32>
    %382 = vector.multi_reduction <add>, %381, %cst_102 [1] : vector<4x128xf32> to vector<4xf32>
    %383 = vector.shape_cast %382 : vector<4xf32> to vector<4x1xf32>
    %cst_103 = arith.constant 1.280000e+02 : f32
    %384 = vector.broadcast %cst_103 : f32 to vector<4x1xf32>
    %385 = arith.divf %383, %384 : vector<4x1xf32>
    %386 = vector.broadcast %385 : vector<4x1xf32> to vector<4x128xf32>
    %387 = arith.subf %381, %386 : vector<4x128xf32>
    %388 = arith.mulf %387, %387 : vector<4x128xf32>
    %cst_104 = arith.constant dense<0.000000e+00> : vector<4xf32>
    %389 = vector.multi_reduction <add>, %388, %cst_104 [1] : vector<4x128xf32> to vector<4xf32>
    %390 = vector.shape_cast %389 : vector<4xf32> to vector<4x1xf32>
    %cst_105 = arith.constant 1.280000e+02 : f32
    %391 = vector.broadcast %cst_105 : f32 to vector<4x1xf32>
    %392 = arith.divf %390, %391 : vector<4x1xf32>
    %393 = vector.broadcast %385 : vector<4x1xf32> to vector<4x128xf32>
    %394 = arith.subf %381, %393 : vector<4x128xf32>
    %cst_106 = arith.constant 9.99999974E-6 : f32
    %395 = vector.broadcast %cst_106 : f32 to vector<4x1xf32>
    %396 = arith.addf %392, %395 : vector<4x1xf32>
    %397 = math.rsqrt %396 : vector<4x1xf32>
    %398 = vector.broadcast %397 : vector<4x1xf32> to vector<4x128xf32>
    %399 = arith.mulf %394, %398 : vector<4x128xf32>
    %400 = vector.broadcast %4 : vector<1x128xf32> to vector<4x128xf32>
    %401 = arith.mulf %399, %400 : vector<4x128xf32>
    %402 = vector.broadcast %5 : vector<1x128xf32> to vector<4x128xf32>
    %403 = arith.addf %401, %402 : vector<4x128xf32>
    %404 = vector.extract_strided_slice %403 {offsets = [0, 0], sizes = [4, 32], strides = [1, 1]} : vector<4x128xf32> to vector<4x32xf32>
    %405 = arith.negf %404 : vector<4x32xf32>
    %406 = math.exp %405 : vector<4x32xf32>
    %cst_107 = arith.constant 1.000000e+00 : f32
    %407 = vector.broadcast %cst_107 : f32 to vector<4x32xf32>
    %408 = arith.addf %407, %406 : vector<4x32xf32>
    %409 = arith.divf %407, %408 : vector<4x32xf32>
    %410 = vector.extract_strided_slice %403 {offsets = [0, 32], sizes = [4, 32], strides = [1, 1]} : vector<4x128xf32> to vector<4x32xf32>
    %411 = arith.negf %410 : vector<4x32xf32>
    %412 = math.exp %411 : vector<4x32xf32>
    %cst_108 = arith.constant 1.000000e+00 : f32
    %413 = vector.broadcast %cst_108 : f32 to vector<4x32xf32>
    %414 = arith.addf %413, %412 : vector<4x32xf32>
    %415 = arith.divf %413, %414 : vector<4x32xf32>
    %416 = vector.extract_strided_slice %403 {offsets = [0, 64], sizes = [4, 32], strides = [1, 1]} : vector<4x128xf32> to vector<4x32xf32>
    %417 = arith.negf %416 : vector<4x32xf32>
    %418 = math.exp %417 : vector<4x32xf32>
    %cst_109 = arith.constant 1.000000e+00 : f32
    %419 = vector.broadcast %cst_109 : f32 to vector<4x32xf32>
    %420 = arith.addf %419, %418 : vector<4x32xf32>
    %421 = arith.divf %419, %420 : vector<4x32xf32>
    %422 = vector.extract_strided_slice %403 {offsets = [0, 96], sizes = [4, 32], strides = [1, 1]} : vector<4x128xf32> to vector<4x32xf32>
    %423 = math.tanh %422 : vector<4x32xf32>
    %424 = arith.mulf %415, %374 : vector<4x32xf32>
    %425 = arith.mulf %409, %423 : vector<4x32xf32>
    %426 = arith.addf %424, %425 : vector<4x32xf32>
    %427 = arith.mulf %421, %426 : vector<4x32xf32>
    %c0_110 = arith.constant 0 : index
    %c0_111 = arith.constant 0 : index
    %c28 = arith.constant 28 : index
    %c0_112 = arith.constant 0 : index
    %428 = vector.load %arg7[%c0_110, %c0_111, %c28, %c0_112] : memref<1x1x32x32xf32, #tpu.memory_space<vmem>>, vector<1x1x4x32xf32>
    %429 = vector.shape_cast %428 : vector<1x1x4x32xf32> to vector<4x32xf32>
    %430 = vector.shape_cast %427 : vector<4x32xf32> to vector<1x1x4x32xf32>
    tpu.vector_store %arg7[%c0_110, %c0_111, %c28, %c0_112], %430 {strides = array<i32>} : memref<1x1x32x32xf32, #tpu.memory_space<vmem>>, vector<1x1x4x32xf32>,
    %c0_113 = arith.constant 0 : index
    %c0_114 = arith.constant 0 : index
    %431 = vector.load %arg8[%c0_113, %c0_114] : memref<4x32xf32, #tpu.memory_space<vmem>>, vector<4x32xf32>
    tpu.vector_store %arg8[%c0_113, %c0_114], %427 {strides = array<i32>} : memref<4x32xf32, #tpu.memory_space<vmem>>, vector<4x32xf32>,
    %c0_115 = arith.constant 0 : index
    %c0_116 = arith.constant 0 : index
    %432 = vector.load %arg9[%c0_115, %c0_116] : memref<4x32xf32, #tpu.memory_space<vmem>>, vector<4x32xf32>
    tpu.vector_store %arg9[%c0_115, %c0_116], %426 {strides = array<i32>} : memref<4x32xf32, #tpu.memory_space<vmem>>, vector<4x32xf32>,
    return
  }
  func.func @transform_0(%arg0: i32, %arg1: i32) -> (i32, i32, i32, i32) {
    %c0_i32 = arith.constant 0 : i32
    %c0_i32_0 = arith.constant 0 : i32
    %c0_i32_1 = arith.constant 0 : i32
    return %arg0, %arg1, %c0_i32, %c0_i32_0 : i32, i32, i32, i32
  }
  func.func @transform_1(%arg0: i32, %arg1: i32) -> (i32, i32) {
    %c0_i32 = arith.constant 0 : i32
    %c0_i32_0 = arith.constant 0 : i32
    %c0_i32_1 = arith.constant 0 : i32
    return %c0_i32, %c0_i32_0 : i32, i32
  }
  func.func @transform_2(%arg0: i32, %arg1: i32) -> (i32, i32) {
    %c0_i32 = arith.constant 0 : i32
    %c0_i32_0 = arith.constant 0 : i32
    %c0_i32_1 = arith.constant 0 : i32
    return %c0_i32, %c0_i32_0 : i32, i32
  }
  func.func @transform_3(%arg0: i32, %arg1: i32) -> (i32, i32) {
    %c0_i32 = arith.constant 0 : i32
    %c0_i32_0 = arith.constant 0 : i32
    %c0_i32_1 = arith.constant 0 : i32
    return %c0_i32, %c0_i32_0 : i32, i32
  }
  func.func @transform_4(%arg0: i32, %arg1: i32) -> (i32, i32) {
    %c0_i32 = arith.constant 0 : i32
    %c0_i32_0 = arith.constant 0 : i32
    %c0_i32_1 = arith.constant 0 : i32
    return %c0_i32, %c0_i32_0 : i32, i32
  }
  func.func @transform_5(%arg0: i32, %arg1: i32) -> (i32, i32, i32, i32) {
    %c0_i32 = arith.constant 0 : i32
    %c0_i32_0 = arith.constant 0 : i32
    %c0_i32_1 = arith.constant 0 : i32
    return %arg0, %arg1, %c0_i32, %c0_i32_0 : i32, i32, i32, i32
  }
}

</mosaic_0001>

<bundles_post_ra>
// kernel: tpu_custom_call.1
= control target key start
LH: loop header
LB: loop body
LE: loop exit
PB: predicated region body
PF: predicated region fallthrough
CT: control target
= control target key end

     0   :  { %10 = vsyncpa [#allocation5], 0  ;;  %s2636_s0 = inlined_call_operand.hbm [shape: f32[1,2,32,32], index: 0, kind: input, shape index: {}]   ;;  %s2637_s1 = inlined_call_operand.hbm [shape: f32[32,128], index: 1, kind: input, shape index: {}]   ;;  %s2638_s2 = inlined_call_operand.hbm [shape: f32[32,128], index: 2, kind: input, shape index: {}]   ;;  %s2639_s3 = inlined_call_operand.vmem [shape: f32[3,128], index: 3, kind: input, shape index: {}]   ;;  %s2640_s4 = inlined_call_operand.vmem [shape: f32[2,32], index: 4, kind: input, shape index: {}]   ;;  %s2641_s5 = inlined_call_operand.hbm [shape: f32[1,2,32,32], index: 5, kind: output, shape index: {}]  }
   0x1   :  { %12 = vsyncpa [#allocation5 + $0x1], 0 }
   0x2   :  { %13 = vsyncpa [#allocation8], 0 }
   0x3   :  { %14 = vsyncpa [#allocation6], 0 }
   0x4   :  { %16 = vsyncpa [#allocation6 + $0x1], 0  ;;  %s2162_s18 = smov 0   ;;  %s2164_s19 = smov 0  }
   0x5   :  { %s2166_s20 = smov 0   ;;  %s2168_s21 = smov 0  }
   0x6   :  { %s2170_s22 = smov 0   ;;  %s2172_s23 = smov 0  }
   0x7 LB: > { %s1534_s24 = sadd.s32 4294967295, %s2116_s23   ;;  %s1535_s25 = sadd.s32 4294967294, %s2116_s23   ;;  %s2116_s23 = sphi %s2172_s23, %s22_s23   ;;  %s2112_s22 = sphi %s2170_s22, %s2665_s22   ;;  %s2108_s21 = sphi %s2168_s21, %s2664_s21   ;;  %s2104_s20 = sphi %s2166_s20, %s2663_s20   ;;  %s2100_s19 = sphi %s2164_s19, %s2662_s19   ;;  %s2096_s18 = sphi %s2162_s18, %s2661_s18  }
   0x8   : > { %p56_p0 = scmp.ne.s32.totalorder %s2100_s19, %s2096_s18  ;;  %p2196_p1 = scmp.eq.s32.totalorder %s1534_s24, 0 }
   0x9   : > { %p2200_p2 = scmp.eq.s32.totalorder %s1534_s24, 1  ;;  %p172_p3 = scmp.eq.s32.totalorder %s1535_s25, 1 }
   0xa   : > { %s2647_s26 = scalar_select %p2196_p1, 1, 0 }
   0xb   : > { %p2206_p4 = por %p2196_p1, %p56_p0  ;;  %p1536_p5 = scmp.ge.s32.totalorder %s2116_s23, 1 }
   0xc   : > { %p2211_p6 = por %p172_p3, %p56_p0  ;;  %p179_p7 = scmp.lt.s32.totalorder %s2116_s23, 3 }
   0xd   : > { %s2649_s28 = scalar_select %p2206_p4, 1, 0 }
   0xe   : > { %s2650_s29 = scalar_select %p2211_p6, 1, 0 }
   0xf   : > { %p2216_p8 = pnand %p1536_p5, %p179_p7  ;;  %s2118_s6 = smov [#allocation7]  }
  0x10   : > { %s191_s7 = sshll.u32 %s2118_s6, 4  ;;  %s2119_s9 = smov [#allocation9]   ;;  %s2220_s7 = int_to_ptr.vmem [resolvable:$true] %s191_s7 }
  0x11   : > { %p1799_p9 = pneg %p2216_p8  ;;  %s204_s10 = sshll.u32 %s2119_s9, 4  ;;  %s2231_s10 = int_to_ptr.vmem [resolvable:$true] %s204_s10 }
  0x12   : > { %s1944_s13 = scalar_lea.hbm %s2637_s1, 512 }
  0x13   : > { %p2227_p11 = pnand %p1799_p9, %p2196_p1  ;;  %p1945_p12 = scmp.ne.s32.totalorder %s2637_s1, %s1944_s13 }
  0x14   : > { %p1951_p5 = scmp.lt.u32.totalorder %s1944_s13, %s2637_s1 }
  0x15   : > { %p1946_p13 = pneg %p2227_p11 }
  0x17   : > { %p1947_p0 = pnand %p1946_p13, %p1945_p12 }
  0x19   : > { %p1948_p3 = pneg %p1947_p0 }
  0x1b   : > { %p1953_p7 = pnand %p1951_p5, %p1948_p3 }
  0x1d   : > { %1956 = shalt.err (!%p1953_p7)
}
  0x1e   : > { %s1957_s24 = scalar_lea.vmem %s2220_s7, 512  ;;  %p1965_p1 = scmp.lt.s32.totalorder %s2220_s7, %s2220_s7 }
  0x1f   : > { %p1958_p9 = scmp.ne.s32.totalorder %s2220_s7, %s1957_s24  ;;  %p1966_p12 = scmp.lt.s32.totalorder %s1957_s24, %s1957_s24 }
  0x21   : > { %p1960_p10 = pnand %p1958_p9, %p1946_p13  ;;  %p1967_p0 = por %p1966_p12, %p1965_p1 }
  0x23   : > { %p1961_p6 = pneg %p1960_p10 }
  0x25   : > { %p1968_p4 = pnand %p1967_p0, %p1961_p6 }
  0x27   : > { %1971 = shalt.err (!%p1968_p4)
}
  0x28   : > { %s2645_s25 = smov 128   ;;  %s2121_s6 = smov 8  }
  0x29   : > { %1802 = dma.hbm_to_vmem [thread:$0]  (!%p2227_p11), %s2637_s1, 512, %s2220_s7, [#allocation8], %s2645_s25, %s2645_s25, %s2121_s6  }
  0x2a   : > { %s1972_s14 = scalar_lea.hbm %s2638_s2, 512 }
  0x2b   : > { %p1973_p1 = scmp.ne.s32.totalorder %s2638_s2, %s1972_s14  ;;  %p1979_p10 = scmp.lt.u32.totalorder %s1972_s14, %s2638_s2 }
  0x2d   : > { %p1975_p4 = pnand %p1973_p1, %p1946_p13 }
  0x2f   : > { %p1976_p6 = pneg %p1975_p4 }
  0x31   : > { %p1981_p3 = pnand %p1979_p10, %p1976_p6 }
  0x33   : > { %1984 = shalt.err (!%p1981_p3)
}
  0x34   : > { %s1985_s7 = scalar_lea.vmem %s2231_s10, 512  ;;  %p1993_p12 = scmp.lt.s32.totalorder %s2231_s10, %s2231_s10 }
  0x35   : > { %p1986_p5 = scmp.ne.s32.totalorder %s2231_s10, %s1985_s7  ;;  %p1994_p0 = scmp.lt.s32.totalorder %s1985_s7, %s1985_s7 }
  0x37   : > { %p1988_p7 = pnand %p1986_p5, %p1946_p13  ;;  %p1995_p1 = por %p1994_p0, %p1993_p12 }
  0x39   : > { %p1989_p9 = pneg %p1988_p7 }
  0x3b   : > { %p1996_p4 = pnand %p1995_p1, %p1989_p9 }
  0x3d   : > { %1999 = shalt.err (!%p1996_p4)
}
  0x3e   : > { %1805 = dma.hbm_to_vmem [thread:$0]  (!%p2227_p11), %s2638_s2, 512, %s2231_s10, [#allocation8], %s2645_s25, %s2645_s25, %s2121_s6  }
  0x3f   : > { %s31_s8 = sadd.s32 1, %s2112_s22  ;;  %s43_s12 = sadd.s32 1, %s2104_s20 }
  0x40   : > { %p32_p13 = scmp.ge.s32.totalorder %s31_s8, 2  ;;  %p50_p6 = scmp.ne.s32.totalorder %s2104_s20, %s2100_s19 }
  0x41   : > { %p51_p10 = scmp.eq.s32.totalorder %s2116_s23, 0  ;;  %p1816_p3 = scmp.lt.s32.totalorder %s2116_s23, 2 }
  0x42   : > { %s2667_s8 = smov (%p32_p13, %s31_s8), 0  ;;  %p2301_p7 = por %p2200_p2, %p50_p6 }
  0x43   : > { %p52_p5 = por %p51_p10, %p50_p6  ;;  %s39_s14 = ssub.s32 %s2112_s22, %s2667_s8 }
  0x44   : > { %s2653_s13 = scalar_select %p2301_p7, 1, 0 }
  0x45   : > { %s224_s15 = sand.u32 1, %s2104_s20   ;;  %p41_p9 = scmp.eq.s32.totalorder %s39_s14, 0 }
  0x46   : > { %s1540_s10 = sshll.u32 %s224_s15, 5  ;;  %s1579_s16 = sshll.u32 %s2112_s22, 9 }
  0x47   : > { %s2310_s17 = scalar_select %p41_p9, %s2104_s20, %s43_s12  }
  0x48   : > { %s2315_s9 = scalar_lea.hbm %s2636_s0, %s1579_s16  ;;  %s228_s27 = scalar_lea.vmem [#allocation4], %s1540_s10 }
  0x49   : > { %s237_s11 = sshll.u32 %s228_s27, 4  ;;  %p2319_p2 = pnand %p1816_p3, %p52_p5  ;;  %s2323_s11 = int_to_ptr.vmem [resolvable:$true] %s237_s11 }
  0x4a   : > { %s2325_s12 = scalar_lea.sflag [#allocation5], %s224_s15  ;;  %s2000_s14 = scalar_lea.hbm %s2315_s9, 512 }
  0x4b   : > { %p2001_p11 = scmp.ne.s32.totalorder %s2315_s9, %s2000_s14  ;;  %p2002_p12 = pneg %p2319_p2 }
  0x4c   : > { %s2005_s24 = scalar_lea.hbm %s2636_s0, 1024  ;;  %p2006_p4 = scmp.lt.u32.totalorder %s2315_s9, %s2636_s0 }
  0x4d   : > { %p2003_p0 = pnand %p2002_p12, %p2001_p11  ;;  %p2007_p13 = scmp.lt.u32.totalorder %s2005_s24, %s2000_s14 }
  0x4e   : > { %p2009_p10 = scmp.lt.u32.totalorder %s2000_s14, %s2315_s9 }
  0x4f   : > { %p2004_p1 = pneg %p2003_p0  ;;  %p2008_p6 = por %p2007_p13, %p2006_p4 }
  0x51   : > { %p2010_p3 = por %p2009_p10, %p2008_p6 }
  0x53   : > { %p2011_p5 = pnand %p2010_p3, %p2004_p1 }
  0x55   : > { %2014 = shalt.err (!%p2011_p5)
}
  0x56   : > { %s2015_s15 = scalar_lea.vmem %s2323_s11, 512  ;;  %s2122_s10 = smov [#allocation4]  }
  0x57   : > { %p2016_p9 = scmp.ne.s32.totalorder %s2323_s11, %s2015_s15  ;;  %s2020_s16 = sshll.u32 %s2122_s10, 4  ;;  %s2021_s16 = int_to_ptr.vmem [resolvable:$false] %s2020_s16 }
  0x58   : > { %s2022_s7 = scalar_lea.vmem %s2021_s16, 1024  ;;  %p2023_p7 = scmp.lt.s32.totalorder %s2323_s11, %s2021_s16 }
  0x59   : > { %p2018_p11 = pnand %p2016_p9, %p2002_p12  ;;  %p2024_p4 = scmp.lt.s32.totalorder %s2022_s7, %s2015_s15 }
  0x5b   : > { %p2019_p0 = pneg %p2018_p11  ;;  %p2025_p13 = por %p2024_p4, %p2023_p7 }
  0x5d   : > { %p2026_p6 = pnand %p2025_p13, %p2019_p0 }
  0x5f   : > { %2029 = shalt.err (!%p2026_p6)
}
  0x60   : > { %s2655_s14 = smov 128   ;;  %249 = sbr.rel (%p2216_p8) target bundleno = 8191 (0x1fff), region = 40 }
  0x61   : > { %1809 = dma.hbm_to_vmem [thread:$0]  (!%p2319_p2), %s2315_s9, 512, %s2323_s11, %s2325_s12, %s2655_s14, %s2655_s14, %s2121_s6  }
  0x62   : > { %s2359_s24 = sand.u32 (!%p2216_p8), 1, %s2100_s19   ;;  %p2656_p7 = scmp.ne.s32.totalorder (!%p2216_p8), %s2649_s28, 0 }
  0x63   : > { %s1544_s27 = sshll.u32 (!%p2216_p8), %s2359_s24, 5  ;;  %s252_s15 = scalar_lea.sflag (!%p2216_p8), [#allocation5], %s2359_s24 }
  0x64   : > { %s2363_s10 = scalar_lea.vmem (!%p2216_p8), [#allocation4], %s1544_s27 }
  0x67   : > { %2083 = dma.done.wait (%p2656_p7), %s252_s15, 512  }
  0x68   : > { %2085 = vsyncadd (%p2656_p7), %s252_s15, 4294966784  ;;  %p2657_p2 = scmp.ne.s32.totalorder %s2647_s26, 0 }
  0x6a   : > { %2087 = dma.done.wait (%p2657_p2), [#allocation8], 1024  }
  0x6b   : > { %2089 = vsyncadd (%p2657_p2), [#allocation8], 4294966272  ;;  %s2373_s30 = scalar_lea.vmem [#allocation10], %s1544_s27  ;;  %p1548_p8 = scmp.ne.s32.totalorder %s2108_s21, 0 }
  0x6c   : > { %v1549_v0 = vld [vmem:[%s2640_s4] ss:$0 sm:$0xff] (!%p1548_p8)  ;;  %vm299_vm0 = vcmask (!%p1548_p8), 257024   ;;  %v1550_v1 = vld [vmem:[%s2640_s4 + $0x1] ss:$0 sm:$0xff] (!%p1548_p8) }
  0x6d   : > { %293 = sbr.rel (%p1548_p8) target bundleno = 116 (0x74), region = 56  ;;  %300 = vst.msk [vmem:[#allocation2] sm:$0xf] (!%p1548_p8), %vm299_vm0, %v1549_v0  ;;  %306 = vst.msk [vmem:[#allocation3] sm:$0xf] (!%p1548_p8), %vm299_vm0, %v1550_v1 }
  0x74 PF: > { %v318_v2 = vld [vmem:[#allocation7] sm:$0xff]  ;;  %v319_v3 = vld [vmem:[#allocation7 + $0x8] sm:$0xff]  ;;  %vm326_vm1 = vcmask 261120   ;;  %v2123_v6 = vmov 0.0|0.0   ;;  %v320_v8 = vld [vmem:[#allocation7 + $0x10] sm:$0xff]  ;;  %vm2124_vm2 = vmmov 0  }
  0x75   : > { %v310_v4 = vld [vmem:[#allocation9] sm:$0xff]  ;;  %v1731_v5 = vpack.c.bf16 %v319_v3, %v318_v2  ;;  %1739 = vmatprep.subr.bf16.mxu1 %v2123_v6  ;;  %v311_v7 = vld [vmem:[#allocation9 + $0x8] sm:$0xff]  ;;  %v321_v9 = vld [vmem:[#allocation7 + $0x18] sm:$0xff]  ;;  %v2125_v15 = vmov 0.0   ;;  %vm500_vm3 = vcmask 1043456   ;;  %s2126_s27 = smov 32  }
  0x76   : > { %v2383_v10 = vpack.c.bf16 %v311_v7, %v310_v4  ;;  %v1735_v11 = vpack.c.bf16 %v321_v9, %v320_v8  ;;  %v314_v12 = vld [vmem:[%s2363_s10] sm:$0xff]  ;;  %v312_v13 = vld [vmem:[#allocation9 + $0x10] sm:$0xff]  ;;  %v313_v14 = vld [vmem:[#allocation9 + $0x18] sm:$0xff]  ;;  %1651 = vmatprep.mubr.msk.f32.mxu1 %vm2124_vm2, %v2125_v15  ;;  %s2127_s15 = smov 64   ;;  %vm556_vm4 = vcmask 257024   ;;  %vm634_vm5 = vcmask 1047556  }
  0x77   : > { %1732 = vmatprep.subr.bf16.mxu0 %v1731_v5  ;;  %1637 = vmatprep.mubr.msk.f32.mxu0 %vm326_vm1, %v314_v12  ;;  %v2390_v16 = vpack.c.bf16 %v313_v14, %v312_v13  ;;  %v315_v17 = vld [vmem:[%s2363_s10 + $0x8] sm:$0xff]  ;;  %v424_v18 = vld [vmem:[#allocation2] sm:$0xf]  ;;  %v425_v42 = vld [vmem:[#allocation3] sm:$0xf]  ;;  %vm679_vm6 = vcmask 261124  }
  0x78   : > { %1734 = vmatpush3.bf16.msra.mxu0 %v1731_v5  ;;  %1741 = vmatpush3.bf16.msra.mxu1 %v2383_v10  ;;  %v2412_v19 = vld [vmem:[%s2639_s3] ss:$0 sm:$0xff]  ;;  %v2425_v36 = vld [vmem:[%s2639_s3 + $0x1] ss:$0 sm:$0xff]  ;;  %v2430_v38 = vld [vmem:[%s2639_s3 + $0x2] ss:$0 sm:$0xff] }
  0x79   : > { %1736 = vmatprep.subr.bf16.mxu0 %v1735_v11  ;;  %1742 = vmatprep.subr.bf16.mxu1 %v2123_v6  ;;  %v316_v49 = vld [vmem:[%s2363_s10 + $0x10] sm:$0xff]  ;;  %v317_v50 = vld [vmem:[%s2363_s10 + $0x18] sm:$0xff]  ;;  %s2128_s10 = smov 96   ;;  %s1580_s25 = sshll.u32 %s2108_s21, 9 }
  0x7a   : > { %s1428_s6 = sshll.u32 %s2373_s30, 4  ;;  %s2582_s26 = scalar_lea.hbm %s2641_s5, %s1580_s25  ;;  %s2584_s6 = int_to_ptr.vmem [resolvable:$true] %s1428_s6 }
  0x7b   : > { %s1413_s28 = scalar_lea.sflag [#allocation6], %s2359_s24  ;;  %s2030_s12 = scalar_lea.vmem %s2584_s6, 512 }
  0x7c   : > { %1738 = vmatpush3.bf16.msra.mxu0 %v1735_v11  ;;  %1744 = vmatpush3.bf16.msra.mxu1 %v2390_v16  ;;  %p2031_p12 = scmp.ne.s32.totalorder %s2584_s6, %s2030_s12  ;;  %p2658_p1 = scmp.ne.s32.totalorder %s2653_s13, 0 }
  0x7d   : > { %1745 = vmatprep.subr.bf16.mxu0 %v2123_v6  ;;  %1751 = vmatprep.subr.bf16.mxu1 %v2123_v6  ;;  %s2129_s21 = smov [#allocation10]  }
  0x7e   : > { %p2032_p10 = pnand %p2031_p12, %p2658_p1  ;;  %s2034_s16 = sshll.u32 %s2129_s21, 4  ;;  %s2035_s16 = int_to_ptr.vmem [resolvable:$false] %s2034_s16 }
  0x7f   : > { %1638 = vmatmul.mubr.msk.f32.vlgmr.msra.gmra.mrb[0].mxu0 %vm326_vm1, %v315_v17  ;;  %1652 = vmatmul.mubr.msk.f32.vlgmr.msra.gmra.mrb[0].mxu1 %vm326_vm1, %v424_v18  ;;  %s2036_s7 = scalar_lea.vmem %s2035_s16, 1024  ;;  %p2037_p5 = scmp.lt.s32.totalorder %s2584_s6, %s2035_s16 }
  0x80   : > { %1747 = vmatpush3.bf16.msra.mxu0 %v2383_v10  ;;  %1753 = vmatpush3.bf16.msra.mxu1 %v2383_v10  ;;  %p2033_p3 = pneg %p2032_p10  ;;  %p2038_p9 = scmp.lt.s32.totalorder %s2036_s7, %s2030_s12 }
  0x81   : > { %1748 = vmatprep.subr.bf16.mxu0 %v2123_v6  ;;  %1754 = vmatprep.subr.bf16.mxu1 %v2123_v6 }
  0x82   : > { %1673 = vmatprep.mubr.msk.f32.mxu1 %vm2124_vm2, %v2125_v15  ;;  %1640 = vmatprep.mubr.msk.f32.mxu0 %vm326_vm1, %v316_v49  ;;  %p2039_p11 = por %p2038_p9, %p2037_p5 }
  0x83   : > { %1641 = vmatmul.mubr.msk.f32.gmra.mrb[2].mxu0 %vm326_vm1, %v317_v50 }
  0x84   : > { %1750 = vmatpush3.bf16.msra.mxu0 %v2390_v16  ;;  %1756 = vmatpush3.bf16.msra.mxu1 %v2390_v16  ;;  %p2040_p0 = pnand %p2039_p11, %p2033_p3 }
  0x85   : > { %1757 = vmatprep.subr.bf16.mxu0 %v2123_v6  ;;  %1763 = vmatprep.subr.bf16.mxu1 %v2123_v6 }
  0x86   : > { %1662 = vmatprep.mubr.msk.f32.mxu0 %vm2124_vm2, %v2125_v15 }
 0x152   : > { %v2414_v20 = vpop.f32.mrb[0].mxu0  ;;  %v495_v21 = vpop.f32.mrb[0].mxu1 }
 0x153   : > { %v405_v22 = vpop.f32.mrb[1].mxu0  ;;  %v1653_v23 = vpop.f32.mrb[1].mxu1 }
 0x154   : > { %v2417_v24 = vadd.f32 %v2412_v19, %v405_v22 }
 0x156   : > { %v499_v25 = vadd.f32 %v495_v21, %v2417_v24  ;;  %v2445_v57 = vpop.f32.mrb[2].mxu0 }
 0x157   : > { %v2447_v58 = vpop.f32.mrb[3].mxu0 }
 0x158   : > { %v501_v26 = vsel %vm500_vm3, %v499_v25, 0.0 }
 0x159   : > { %502 = vadd.xlane.f32.xlu0 %v501_v26 }
 0x1e6   : > { %v503_v27 = vpop.xlane.xlu0 %502 }
 0x1e7   : > { %v505_v28 = vmul.f32 0.0078125, %v503_v27 }
 0x1e9   : > { %v506_v29 = vsub.f32 %v499_v25, %v505_v28 }
 0x1eb   : > { %v507_v30 = vmul.f32 %v506_v29, %v506_v29 }
 0x1ed   : > { %v508_v31 = vsel %vm500_vm3, %v507_v30, 0.0 }
 0x1ee   : > { %509 = vadd.xlane.f32.xlu0 %v508_v31 }
 0x27b   : > { %v510_v32 = vpop.xlane.xlu0 %509 }
 0x27c   : > { %v511_v33 = vmul.f32 0.0078125, %v510_v32 }
 0x27e   : > { %v512_v34 = vadd.f32 1e-05, %v511_v33 }
 0x280   : > { %1880 = vrsqrt.f32 %v512_v34  ;;  %v411_v34 = vadd.f32 %v2414_v20, %v2412_v19 }
 0x28a   : > { %v1881_v35 = vpop.eup %1880 }
 0x28b   : > { %v514_v37 = vmul.f32 %v1881_v35, %v506_v29 }
 0x28d   : > { %v519_v39 = vmul.f32 %v2425_v36, %v514_v37 }
 0x28f   : > { %v524_v40 = vadd.f32 %v2430_v38, %v519_v39 }
 0x291   : > { %1882 = vtanh.f32 %v524_v40  ;;  %v1559_v43 = vmul.f32 -1.442695, %v524_v40 }
 0x293   : > { %1884 = vpow2.f32 %v1559_v43 }
 0x29b   : > { %v1883_v41 = vpop.eup %1882 }
 0x29c   : > { %538 = vrot.lane.b32.xlu1 %v1883_v41, %s2126_s27 }
 0x29d   : > { %v1885_v44 = vpop.eup %1884 }
 0x29e   : > { %v528_v45 = vadd.f32 1.0, %v1885_v44 }
 0x2a0   : > { %533 = vrot.lane.b32.xlu1 %v425_v42, %s2126_s27  ;;  %1886 = vrcp.f32 %v528_v45 }
 0x2aa   : > { %v1887_v46 = vpop.eup %1886 }
 0x30e   : > { %v539_v47 = vpop.permute.xlu1 %538 }
 0x30f   : > { %v541_v48 = vmul.f32 %v1887_v46, %v539_v47 }
 0x311   : > { %543 = vrot.lane.b32.xlu0 %v541_v48, %s2126_s27 }
 0x312   : > { %v534_v51 = vpop.permute.xlu1 %533 }
 0x313   : > { %v536_v52 = vmul.f32 %v1887_v46, %v534_v51 }
 0x383   : > { %v544_v53 = vpop.permute.xlu0 %543 }
 0x384   : > { %v546_v54 = vadd.f32 %v544_v53, %v536_v52 }
 0x386   : > { %548 = vrot.lane.b32.xlu1 %v546_v54, %s2126_s27  ;;  %v657_v26 = vrot.slane %v546_v54, 4 }
 0x3f8   : > { %v549_v55 = vpop.permute.xlu1 %548 }
 0x3f9   : > { %v551_v56 = vmul.f32 %v1887_v46, %v549_v55 }
 0x3fb   : > { %553 = vrot.lane.b32.xlu1 %v551_v56, %s2127_s15 }
 0x46d   : > { %v554_v59 = vpop.permute.xlu1 %553 }
 0x46e   : > { %557 = vst.msk [vmem:[%s2373_s30] sm:$0xf] %vm556_vm4, %v554_v59  ;;  %1663 = vmatmul.mubr.msk.f32.vlgmr.msra.gmra.mrb[4].mxu0 %vm326_vm1, %v554_v59 }
 0x46f   : > { %1759 = vmatpush3.bf16.msra.mxu0 %v2383_v10  ;;  %1684 = vmatprep.mubr.msk.f32.mxu0 %vm2124_vm2, %v2125_v15 }
 0x470   : > { %1760 = vmatprep.subr.bf16.mxu0 %v2123_v6 }
 0x473   : > { %1762 = vmatpush3.bf16.msra.mxu0 %v2390_v16 }
 0x474   : > { %1769 = vmatprep.subr.bf16.mxu0 %v2123_v6 }
 0x541   : > { %v626_v60 = vpop.f32.mrb[4].mxu0 }
 0x542   : > { %v631_v61 = vrot.slane %v626_v60, 4  ;;  %v1664_v62 = vpop.f32.mrb[5].mxu0 }
 0x544   : > { %v633_v63 = vadd.f32 %v631_v61, %v2417_v24 }
 0x546   : > { %v635_v0 = vsel %vm634_vm5, %v633_v63, 0.0 }
 0x547   : > { %636 = vadd.xlane.f32.xlu1 %v635_v0 }
 0x5d4   : > { %v637_v1 = vpop.xlane.xlu1 %636 }
 0x5d5   : > { %v638_v2 = vmul.f32 0.0078125, %v637_v1 }
 0x5d7   : > { %v639_v3 = vsub.f32 %v633_v63, %v638_v2 }
 0x5d9   : > { %v640_v4 = vmul.f32 %v639_v3, %v639_v3 }
 0x5db   : > { %v641_v5 = vsel %vm634_vm5, %v640_v4, 0.0 }
 0x5dc   : > { %642 = vadd.xlane.f32.xlu0 %v641_v5 }
 0x669   : > { %v643_v7 = vpop.xlane.xlu0 %642 }
 0x66a   : > { %v644_v8 = vmul.f32 0.0078125, %v643_v7 }
 0x66c   : > { %v645_v9 = vadd.f32 1e-05, %v644_v8 }
 0x66e   : > { %1888 = vrsqrt.f32 %v645_v9 }
 0x678   : > { %v1889_v11 = vpop.eup %1888 }
 0x679   : > { %v647_v12 = vmul.f32 %v1889_v11, %v639_v3 }
 0x67b   : > { %v648_v13 = vmul.f32 %v2425_v36, %v647_v12 }
 0x67d   : > { %v649_v14 = vadd.f32 %v2430_v38, %v648_v13 }
 0x67f   : > { %1890 = vtanh.f32 %v649_v14  ;;  %v1561_v18 = vmul.f32 -1.442695, %v649_v14 }
 0x681   : > { %1892 = vpow2.f32 %v1561_v18 }
 0x689   : > { %v1891_v17 = vpop.eup %1890 }
 0x68a   : > { %661 = vrot.lane.b32.xlu1 %v1891_v17, %s2126_s27 }
 0x68b   : > { %v1893_v21 = vpop.eup %1892 }
 0x68c   : > { %v653_v22 = vadd.f32 1.0, %v1893_v21 }
 0x68e   : > { %1894 = vrcp.f32 %v653_v22 }
 0x698   : > { %v1895_v23 = vpop.eup %1894 }
 0x699   : > { %v659_v27 = vmul.f32 %v1895_v23, %v657_v26 }
 0x6fc   : > { %v662_v24 = vpop.permute.xlu1 %661 }
 0x6fd   : > { %v664_v25 = vmul.f32 %v1895_v23, %v662_v24 }
 0x6ff   : > { %666 = vrot.lane.b32.xlu0 %v664_v25, %s2126_s27 }
 0x771   : > { %v667_v28 = vpop.permute.xlu0 %666 }
 0x772   : > { %v669_v29 = vadd.f32 %v667_v28, %v659_v27 }
 0x774   : > { %671 = vrot.lane.b32.xlu1 %v669_v29, %s2126_s27  ;;  %v779_v61 = vrot.slane %v669_v29, 4 }
 0x7e6   : > { %v672_v30 = vpop.permute.xlu1 %671 }
 0x7e7   : > { %v2466_v31 = vmul.f32 %v1895_v23, %v672_v30 }
 0x7e9   : > { %v681_v32 = vrot.slane %v2466_v31, 4 }
 0x7eb   : > { %682 = vrot.lane.b32.xlu1 %v681_v32, %s2127_s15 }
 0x85d   : > { %v683_v33 = vpop.permute.xlu1 %682 }
 0x85e   : > { %1674 = vmatmul.mubr.msk.f32.vlgmr.msra.gmra.mrb[2].mxu1 %vm326_vm1, %v683_v33 }
 0x85f   : > { %1765 = vmatpush3.bf16.msra.mxu1 %v2383_v10  ;;  %1695 = vmatprep.mubr.msk.f32.mxu1 %vm2124_vm2, %v2125_v15 }
 0x860   : > { %1766 = vmatprep.subr.bf16.mxu1 %v2123_v6 }
 0x863   : > { %1768 = vmatpush3.bf16.msra.mxu1 %v2390_v16 }
 0x864   : > { %1775 = vmatprep.subr.bf16.mxu1 %v2123_v6 }
 0x931   : > { %v752_v35 = vpop.f32.mrb[2].mxu1 }
 0x932   : > { %v756_v37 = vadd.f32 %v752_v35, %v411_v34  ;;  %v1675_v39 = vpop.f32.mrb[3].mxu1 }
 0x934   : > { %v757_v40 = vsel %vm500_vm3, %v756_v37, 0.0 }
 0x935   : > { %758 = vadd.xlane.f32.xlu1 %v757_v40 }
 0x9c2   : > { %v759_v41 = vpop.xlane.xlu1 %758 }
 0x9c3   : > { %v760_v42 = vmul.f32 0.0078125, %v759_v41 }
 0x9c5   : > { %v761_v43 = vsub.f32 %v756_v37, %v760_v42 }
 0x9c7   : > { %v762_v44 = vmul.f32 %v761_v43, %v761_v43 }
 0x9c9   : > { %v763_v45 = vsel %vm500_vm3, %v762_v44, 0.0 }
 0x9ca   : > { %764 = vadd.xlane.f32.xlu0 %v763_v45  ;;  %v416_v45 = vadd.f32 %v2412_v19, %v2447_v58 }
 0xa57   : > { %v765_v46 = vpop.xlane.xlu0 %764 }
 0xa58   : > { %v766_v47 = vmul.f32 0.0078125, %v765_v46 }
 0xa5a   : > { %v767_v48 = vadd.f32 1e-05, %v766_v47 }
 0xa5c   : > { %1896 = vrsqrt.f32 %v767_v48 }
 0xa66   : > { %v1897_v49 = vpop.eup %1896 }
 0xa67   : > { %v769_v50 = vmul.f32 %v1897_v49, %v761_v43 }
 0xa69   : > { %v770_v20 = vmul.f32 %v2425_v36, %v769_v50 }
 0xa6b   : > { %v771_v51 = vadd.f32 %v2430_v38, %v770_v20 }
 0xa6d   : > { %1898 = vtanh.f32 %v771_v51  ;;  %v1563_v53 = vmul.f32 -1.442695, %v771_v51 }
 0xa6f   : > { %1900 = vpow2.f32 %v1563_v53 }
 0xa77   : > { %v1899_v52 = vpop.eup %1898 }
 0xa78   : > { %783 = vrot.lane.b32.xlu1 %v1899_v52, %s2126_s27 }
 0xa79   : > { %v1901_v54 = vpop.eup %1900 }
 0xa7a   : > { %v775_v55 = vadd.f32 1.0, %v1901_v54 }
 0xa7c   : > { %1902 = vrcp.f32 %v775_v55 }
 0xa86   : > { %v1903_v56 = vpop.eup %1902 }
 0xa87   : > { %v781_v62 = vmul.f32 %v1903_v56, %v779_v61 }
 0xaea   : > { %v784_v59 = vpop.permute.xlu1 %783 }
 0xaeb   : > { %v786_v60 = vmul.f32 %v1903_v56, %v784_v59 }
 0xaed   : > { %788 = vrot.lane.b32.xlu0 %v786_v60, %s2126_s27 }
 0xb5f   : > { %v789_v63 = vpop.permute.xlu0 %788 }
 0xb60   : > { %v791_v0 = vadd.f32 %v789_v63, %v781_v62 }
 0xb62   : > { %793 = vrot.lane.b32.xlu1 %v791_v0, %s2126_s27  ;;  %v900_v35 = vrot.slane %v791_v0, 4 }
 0xbd4   : > { %v794_v1 = vpop.permute.xlu1 %793 }
 0xbd5   : > { %v796_v2 = vmul.f32 %v1903_v56, %v794_v1 }
 0xbd7   : > { %798 = vrot.lane.b32.xlu1 %v796_v2, %s2127_s15 }
 0xc49   : > { %v799_v3 = vpop.permute.xlu1 %798 }
 0xc4a   : > { %801 = vst.msk [vmem:[%s2373_s30 + $0x8] sm:$0xf] %vm556_vm4, %v799_v3  ;;  %1685 = vmatmul.mubr.msk.f32.vlgmr.msra.gmra.mrb[6].mxu0 %vm326_vm1, %v799_v3 }
 0xc4b   : > { %1771 = vmatpush3.bf16.msra.mxu0 %v2383_v10  ;;  %1706 = vmatprep.mubr.msk.f32.mxu0 %vm2124_vm2, %v2125_v15 }
 0xc4c   : > { %1772 = vmatprep.subr.bf16.mxu0 %v2123_v6 }
 0xc4f   : > { %1774 = vmatpush3.bf16.msra.mxu0 %v2390_v16 }
 0xc50   : > { %1781 = vmatprep.subr.bf16.mxu0 %v2123_v6 }
 0xd1d   : > { %v870_v4 = vpop.f32.mrb[6].mxu0 }
 0xd1e   : > { %v875_v5 = vrot.slane %v870_v4, 4  ;;  %v1686_v7 = vpop.f32.mrb[7].mxu0 }
 0xd20   : > { %v877_v8 = vadd.f32 %v875_v5, %v411_v34 }
 0xd22   : > { %v878_v9 = vsel %vm634_vm5, %v877_v8, 0.0 }
 0xd23   : > { %879 = vadd.xlane.f32.xlu0 %v878_v9 }
 0xdb0   : > { %v880_v11 = vpop.xlane.xlu0 %879 }
 0xdb1   : > { %v881_v12 = vmul.f32 0.0078125, %v880_v11 }
 0xdb3   : > { %v882_v13 = vsub.f32 %v877_v8, %v881_v12 }
 0xdb5   : > { %v883_v14 = vmul.f32 %v882_v13, %v882_v13 }
 0xdb7   : > { %v884_v17 = vsel %vm634_vm5, %v883_v14, 0.0 }
 0xdb8   : > { %885 = vadd.xlane.f32.xlu1 %v884_v17 }
 0xe45   : > { %v886_v18 = vpop.xlane.xlu1 %885 }
 0xe46   : > { %v887_v21 = vmul.f32 0.0078125, %v886_v18 }
 0xe48   : > { %v888_v22 = vadd.f32 1e-05, %v887_v21 }
 0xe4a   : > { %1904 = vrsqrt.f32 %v888_v22 }
 0xe54   : > { %v1905_v23 = vpop.eup %1904 }
 0xe55   : > { %v890_v24 = vmul.f32 %v1905_v23, %v882_v13 }
 0xe57   : > { %v891_v25 = vmul.f32 %v2425_v36, %v890_v24 }
 0xe59   : > { %v892_v26 = vadd.f32 %v2430_v38, %v891_v25 }
 0xe5b   : > { %1906 = vtanh.f32 %v892_v26  ;;  %v1565_v28 = vmul.f32 -1.442695, %v892_v26 }
 0xe5d   : > { %1908 = vpow2.f32 %v1565_v28 }
 0xe65   : > { %v1907_v27 = vpop.eup %1906 }
 0xe66   : > { %904 = vrot.lane.b32.xlu0 %v1907_v27, %s2126_s27 }
 0xe67   : > { %v1909_v29 = vpop.eup %1908 }
 0xe68   : > { %v896_v30 = vadd.f32 1.0, %v1909_v29 }
 0xe6a   : > { %1910 = vrcp.f32 %v896_v30 }
 0xe74   : > { %v1911_v32 = vpop.eup %1910 }
 0xe75   : > { %v902_v37 = vmul.f32 %v1911_v32, %v900_v35 }
 0xed8   : > { %v905_v33 = vpop.permute.xlu0 %904 }
 0xed9   : > { %v907_v34 = vmul.f32 %v1911_v32, %v905_v33 }
 0xedb   : > { %909 = vrot.lane.b32.xlu1 %v907_v34, %s2126_s27 }
 0xf4d   : > { %v910_v39 = vpop.permute.xlu1 %909 }
 0xf4e   : > { %v912_v40 = vadd.f32 %v910_v39, %v902_v37 }
 0xf50   : > { %914 = vrot.lane.b32.xlu0 %v912_v40, %s2126_s27  ;;  %v1021_v5 = vrot.slane %v912_v40, 4 }
 0xfc2   : > { %v915_v41 = vpop.permute.xlu0 %914 }
 0xfc3   : > { %v2503_v42 = vmul.f32 %v1911_v32, %v915_v41 }
 0xfc5   : > { %v923_v43 = vrot.slane %v2503_v42, 4 }
 0xfc7   : > { %924 = vrot.lane.b32.xlu1 %v923_v43, %s2127_s15 }
0x1039   : > { %v925_v44 = vpop.permute.xlu1 %924 }
0x103a   : > { %1696 = vmatmul.mubr.msk.f32.vlgmr.msra.gmra.mrb[4].mxu1 %vm326_vm1, %v925_v44 }
0x103b   : > { %1777 = vmatpush3.bf16.msra.mxu1 %v2383_v10  ;;  %1717 = vmatprep.mubr.msk.f32.mxu1 %vm2124_vm2, %v2125_v15 }
0x103c   : > { %1778 = vmatprep.subr.bf16.mxu1 %v2123_v6 }
0x103f   : > { %1780 = vmatpush3.bf16.msra.mxu1 %v2390_v16 }
0x110d   : > { %v994_v46 = vpop.f32.mrb[4].mxu1 }
0x110e   : > { %v998_v47 = vadd.f32 %v994_v46, %v416_v45  ;;  %v1697_v48 = vpop.f32.mrb[5].mxu1 }
0x1110   : > { %v999_v49 = vsel %vm500_vm3, %v998_v47, 0.0 }
0x1111   : > { %1000 = vadd.xlane.f32.xlu0 %v999_v49 }
0x119e   : > { %v1001_v50 = vpop.xlane.xlu0 %1000 }
0x119f   : > { %v1002_v20 = vmul.f32 0.0078125, %v1001_v50  ;;  %v421_v50 = vadd.f32 %v2445_v57, %v2412_v19 }
0x11a1   : > { %v1003_v51 = vsub.f32 %v998_v47, %v1002_v20 }
0x11a3   : > { %v1004_v52 = vmul.f32 %v1003_v51, %v1003_v51 }
0x11a5   : > { %v1005_v53 = vsel %vm500_vm3, %v1004_v52, 0.0 }
0x11a6   : > { %1006 = vadd.xlane.f32.xlu1 %v1005_v53 }
0x1233   : > { %v1007_v54 = vpop.xlane.xlu1 %1006 }
0x1234   : > { %v1008_v55 = vmul.f32 0.0078125, %v1007_v54 }
0x1236   : > { %v1009_v56 = vadd.f32 1e-05, %v1008_v55 }
0x1238   : > { %1912 = vrsqrt.f32 %v1009_v56 }
0x1242   : > { %v1913_v59 = vpop.eup %1912 }
0x1243   : > { %v1011_v60 = vmul.f32 %v1913_v59, %v1003_v51 }
0x1245   : > { %v1012_v58 = vmul.f32 %v2425_v36, %v1011_v60 }
0x1247   : > { %v1013_v61 = vadd.f32 %v2430_v38, %v1012_v58 }
0x1249   : > { %1914 = vtanh.f32 %v1013_v61  ;;  %v1567_v63 = vmul.f32 -1.442695, %v1013_v61 }
0x124b   : > { %1916 = vpow2.f32 %v1567_v63 }
0x1253   : > { %v1915_v62 = vpop.eup %1914 }
0x1254   : > { %1025 = vrot.lane.b32.xlu0 %v1915_v62, %s2126_s27 }
0x1255   : > { %v1917_v0 = vpop.eup %1916 }
0x1256   : > { %v1017_v1 = vadd.f32 1.0, %v1917_v0 }
0x1258   : > { %1918 = vrcp.f32 %v1017_v1 }
0x1262   : > { %v1919_v2 = vpop.eup %1918 }
0x1263   : > { %v1023_v7 = vmul.f32 %v1919_v2, %v1021_v5 }
0x12c6   : > { %v1026_v3 = vpop.permute.xlu0 %1025 }
0x12c7   : > { %v1028_v4 = vmul.f32 %v1919_v2, %v1026_v3 }
0x12c9   : > { %1030 = vrot.lane.b32.xlu1 %v1028_v4, %s2126_s27 }
0x133b   : > { %v1031_v8 = vpop.permute.xlu1 %1030 }
0x133c   : > { %v1033_v9 = vadd.f32 %v1031_v8, %v1023_v7 }
0x133e   : > { %1035 = vrot.lane.b32.xlu0 %v1033_v9, %s2126_s27  ;;  %v1142_v41 = vrot.slane %v1033_v9, 4 }
0x13b0   : > { %v1036_v11 = vpop.permute.xlu0 %1035 }
0x13b1   : > { %v1038_v12 = vmul.f32 %v1919_v2, %v1036_v11 }
0x13b3   : > { %1040 = vrot.lane.b32.xlu1 %v1038_v12, %s2127_s15 }
0x1425   : > { %v1041_v13 = vpop.permute.xlu1 %1040 }
0x1426   : > { %1043 = vst.msk [vmem:[%s2373_s30 + $0x10] sm:$0xf] %vm556_vm4, %v1041_v13  ;;  %1707 = vmatmul.mubr.msk.f32.vlgmr.msra.gmra.mrb[8].mxu0 %vm326_vm1, %v1041_v13 }
0x1427   : > { %1783 = vmatpush3.bf16.msra.mxu0 %v2383_v10  ;;  %1728 = vmatprep.mubr.msk.f32.mxu0 %vm2124_vm2, %v2125_v15 }
0x1428   : > { %1784 = vmatprep.subr.bf16.mxu0 %v2123_v6 }
0x142b   : > { %1786 = vmatpush3.bf16.msra.mxu0 %v2390_v16 }
0x14f9   : > { %v1112_v14 = vpop.f32.mrb[8].mxu0 }
0x14fa   : > { %v1117_v17 = vrot.slane %v1112_v14, 4  ;;  %v1708_v18 = vpop.f32.mrb[9].mxu0 }
0x14fc   : > { %v1119_v21 = vadd.f32 %v1117_v17, %v416_v45 }
0x14fe   : > { %v1120_v22 = vsel %vm634_vm5, %v1119_v21, 0.0 }
0x14ff   : > { %1121 = vadd.xlane.f32.xlu0 %v1120_v22 }
0x158c   : > { %v1122_v23 = vpop.xlane.xlu0 %1121 }
0x158d   : > { %v1123_v24 = vmul.f32 0.0078125, %v1122_v23 }
0x158f   : > { %v1124_v25 = vsub.f32 %v1119_v21, %v1123_v24 }
0x1591   : > { %v1125_v26 = vmul.f32 %v1124_v25, %v1124_v25 }
0x1593   : > { %v1126_v10 = vsel %vm634_vm5, %v1125_v26, 0.0 }
0x1594   : > { %1127 = vadd.xlane.f32.xlu1 %v1126_v10 }
0x1621   : > { %v1128_v27 = vpop.xlane.xlu1 %1127 }
0x1622   : > { %v1129_v15 = vmul.f32 0.0078125, %v1128_v27 }
0x1624   : > { %v1130_v28 = vadd.f32 1e-05, %v1129_v15 }
0x1626   : > { %1920 = vrsqrt.f32 %v1130_v28 }
0x1630   : > { %v1921_v6 = vpop.eup %1920 }
0x1631   : > { %v1132_v16 = vmul.f32 %v1921_v6, %v1124_v25 }
0x1633   : > { %v1133_v29 = vmul.f32 %v2425_v36, %v1132_v16 }
0x1635   : > { %v1134_v30 = vadd.f32 %v2430_v38, %v1133_v29 }
0x1637   : > { %1922 = vtanh.f32 %v1134_v30  ;;  %v1569_v33 = vmul.f32 -1.442695, %v1134_v30 }
0x1639   : > { %1924 = vpow2.f32 %v1569_v33 }
0x1641   : > { %v1923_v32 = vpop.eup %1922 }
0x1642   : > { %1146 = vrot.lane.b32.xlu0 %v1923_v32, %s2126_s27 }
0x1643   : > { %v1925_v34 = vpop.eup %1924 }
0x1644   : > { %v1138_v35 = vadd.f32 1.0, %v1925_v34 }
0x1646   : > { %1926 = vrcp.f32 %v1138_v35 }
0x1650   : > { %v1927_v37 = vpop.eup %1926 }
0x1651   : > { %v1144_v43 = vmul.f32 %v1927_v37, %v1142_v41 }
0x16b4   : > { %v1147_v39 = vpop.permute.xlu0 %1146 }
0x16b5   : > { %v1149_v40 = vmul.f32 %v1927_v37, %v1147_v39 }
0x16b7   : > { %1151 = vrot.lane.b32.xlu1 %v1149_v40, %s2126_s27 }
0x1729   : > { %v1152_v44 = vpop.permute.xlu1 %1151 }
0x172a   : > { %v1154_v45 = vadd.f32 %v1152_v44, %v1144_v43 }
0x172c   : > { %1156 = vrot.lane.b32.xlu0 %v1154_v45, %s2126_s27  ;;  %v1263_v9 = vrot.slane %v1154_v45, 4 }
0x179e   : > { %v1157_v46 = vpop.permute.xlu0 %1156 }
0x179f   : > { %v2538_v47 = vmul.f32 %v1927_v37, %v1157_v46 }
0x17a1   : > { %v1165_v48 = vrot.slane %v2538_v47, 4 }
0x17a3   : > { %1166 = vrot.lane.b32.xlu1 %v1165_v48, %s2127_s15 }
0x1815   : > { %v1167_v49 = vpop.permute.xlu1 %1166 }
0x1816   : > { %1718 = vmatmul.mubr.msk.f32.vlgmr.msra.gmra.mrb[6].mxu1 %vm326_vm1, %v1167_v49 }
0x18e9   : > { %v1236_v20 = vpop.f32.mrb[6].mxu1 }
0x18ea   : > { %v1240_v51 = vadd.f32 %v1236_v20, %v421_v50  ;;  %v1719_v52 = vpop.f32.mrb[7].mxu1 }
0x18ec   : > { %v1241_v53 = vsel %vm500_vm3, %v1240_v51, 0.0 }
0x18ed   : > { %1242 = vadd.xlane.f32.xlu0 %v1241_v53 }
0x197a   : > { %v1243_v54 = vpop.xlane.xlu0 %1242 }
0x197b   : > { %v1244_v55 = vmul.f32 0.0078125, %v1243_v54 }
0x197d   : > { %v1245_v56 = vsub.f32 %v1240_v51, %v1244_v55 }
0x197f   : > { %v1246_v59 = vmul.f32 %v1245_v56, %v1245_v56 }
0x1981   : > { %v1247_v60 = vsel %vm500_vm3, %v1246_v59, 0.0 }
0x1982   : > { %1248 = vadd.xlane.f32.xlu1 %v1247_v60 }
0x1a0f   : > { %v1249_v58 = vpop.xlane.xlu1 %1248 }
0x1a10   : > { %v1250_v61 = vmul.f32 0.0078125, %v1249_v58 }
0x1a12   : > { %v1251_v62 = vadd.f32 1e-05, %v1250_v61 }
0x1a14   : > { %1928 = vrsqrt.f32 %v1251_v62 }
0x1a1e   : > { %v1929_v63 = vpop.eup %1928 }
0x1a1f   : > { %v1253_v0 = vmul.f32 %v1929_v63, %v1245_v56 }
0x1a21   : > { %v1254_v19 = vmul.f32 %v2425_v36, %v1253_v0 }
0x1a23   : > { %v1255_v57 = vadd.f32 %v2430_v38, %v1254_v19 }
0x1a25   : > { %1930 = vtanh.f32 %v1255_v57  ;;  %v1571_v2 = vmul.f32 -1.442695, %v1255_v57 }
0x1a27   : > { %1932 = vpow2.f32 %v1571_v2 }
0x1a2f   : > { %v1931_v1 = vpop.eup %1930 }
0x1a30   : > { %1267 = vrot.lane.b32.xlu0 %v1931_v1, %s2126_s27 }
0x1a31   : > { %v1933_v3 = vpop.eup %1932 }
0x1a32   : > { %v1259_v4 = vadd.f32 1.0, %v1933_v3 }
0x1a34   : > { %1934 = vrcp.f32 %v1259_v4 }
0x1a3e   : > { %v1935_v5 = vpop.eup %1934 }
0x1a3f   : > { %v1265_v11 = vmul.f32 %v1935_v5, %v1263_v9 }
0x1aa2   : > { %v1268_v7 = vpop.permute.xlu0 %1267 }
0x1aa3   : > { %v1270_v8 = vmul.f32 %v1935_v5, %v1268_v7 }
0x1aa5   : > { %1272 = vrot.lane.b32.xlu1 %v1270_v8, %s2126_s27 }
0x1b17   : > { %v1273_v12 = vpop.permute.xlu1 %1272 }
0x1b18   : > { %v1275_v13 = vadd.f32 %v1273_v12, %v1265_v11 }
0x1b1a   : > { %1277 = vrot.lane.b32.xlu0 %v1275_v13, %s2126_s27 }
0x1b8c   : > { %v1278_v14 = vpop.permute.xlu0 %1277 }
0x1b8d   : > { %v1280_v17 = vmul.f32 %v1935_v5, %v1278_v14 }
0x1b8f   : > { %1282 = vrot.lane.b32.xlu1 %v1280_v17, %s2127_s15 }
0x1c01   : > { %v1283_v18 = vpop.permute.xlu1 %1282 }
0x1c02   : > { %1285 = vst.msk [vmem:[%s2373_s30 + $0x18] sm:$0xf] %vm556_vm4, %v1283_v18  ;;  %1729 = vmatmul.mubr.msk.f32.vlgmr.msra.gmra.mrb[10].mxu0 %vm326_vm1, %v1283_v18 }
0x1cd5   : > { %v1354_v21 = vpop.f32.mrb[10].mxu0 }
0x1cd6   : > { %v1359_v22 = vrot.slane %v1354_v21, 4  ;;  %v1730_v23 = vpop.f32.mrb[11].mxu0 }
0x1cd8   : > { %v1361_v24 = vadd.f32 %v1359_v22, %v421_v50 }
0x1cda   : > { %v1362_v25 = vsel %vm634_vm5, %v1361_v24, 0.0 }
0x1cdb   : > { %1363 = vadd.xlane.f32.xlu0 %v1362_v25 }
0x1d68   : > { %v1364_v26 = vpop.xlane.xlu0 %1363 }
0x1d69   : > { %v1365_v10 = vmul.f32 0.0078125, %v1364_v26 }
0x1d6b   : > { %v1366_v27 = vsub.f32 %v1361_v24, %v1365_v10 }
0x1d6d   : > { %v1367_v15 = vmul.f32 %v1366_v27, %v1366_v27 }
0x1d6f   : > { %v1368_v28 = vsel %vm634_vm5, %v1367_v15, 0.0 }
0x1d70   : > { %1369 = vadd.xlane.f32.xlu1 %v1368_v28 }
0x1dfd   : > { %v1370_v6 = vpop.xlane.xlu1 %1369 }
0x1dfe   : > { %v1371_v16 = vmul.f32 0.0078125, %v1370_v6 }
0x1e00   : > { %v1372_v29 = vadd.f32 1e-05, %v1371_v16 }
0x1e02   : > { %1936 = vrsqrt.f32 %v1372_v29 }
0x1e0c   : > { %v1937_v30 = vpop.eup %1936 }
0x1e0d   : > { %v1374_v32 = vmul.f32 %v1937_v30, %v1366_v27 }
0x1e0f   : > { %v1375_v33 = vmul.f32 %v2425_v36, %v1374_v32  ;;  %v1384_v36 = vrot.slane %v1275_v13, 4 }
0x1e11   : > { %v1376_v34 = vadd.f32 %v2430_v38, %v1375_v33 }
0x1e13   : > { %1938 = vtanh.f32 %v1376_v34  ;;  %v1573_v37 = vmul.f32 -1.442695, %v1376_v34 }
0x1e15   : > { %1940 = vpow2.f32 %v1573_v37 }
0x1e1d   : > { %v1939_v35 = vpop.eup %1938 }
0x1e1e   : > { %1388 = vrot.lane.b32.xlu0 %v1939_v35, %s2126_s27 }
0x1e1f   : > { %v1941_v39 = vpop.eup %1940 }
0x1e20   : > { %v1380_v40 = vadd.f32 1.0, %v1941_v39 }
0x1e22   : > { %1942 = vrcp.f32 %v1380_v40 }
0x1e2c   : > { %v1943_v41 = vpop.eup %1942 }
0x1e2d   : > { %v1386_v38 = vmul.f32 %v1943_v41, %v1384_v36 }
0x1e90   : > { %v1389_v43 = vpop.permute.xlu0 %1388 }
0x1e91   : > { %v1391_v44 = vmul.f32 %v1943_v41, %v1389_v43 }
0x1e93   : > { %1393 = vrot.lane.b32.xlu1 %v1391_v44, %s2126_s27 }
0x1e97   : > { %676 = vrot.lane.b32.xlu1 %v2466_v31, %s2127_s15 }
0x1e9b   : > { %1161 = vrot.lane.b32.xlu1 %v2538_v47, %s2127_s15 }
0x1f05   : > { %v1394_v45 = vpop.permute.xlu1 %1393 }
0x1f06   : > { %v1396_v46 = vadd.f32 %v1394_v45, %v1386_v38 }
0x1f08   : > { %1408 = vrot.lane.b32.xlu1 %v1396_v46, %s2128_s10  ;;  %1398 = vrot.lane.b32.xlu0 %v1396_v46, %s2126_s27 }
0x1f09   : > { %v677_v48 = vpop.permute.xlu1 %676 }
0x1f0a   : > { %680 = vst.msk [vmem:[%s2373_s30] sm:$0xf0] %vm679_vm6, %v677_v48 }
0x1f0c   : > { %919 = vrot.lane.b32.xlu0 %v2503_v42, %s2127_s15 }
0x1f0d   : > { %v1162_v31 = vpop.permute.xlu1 %1161 }
0x1f0e   : > { %1164 = vst.msk [vmem:[%s2373_s30 + $0x10] sm:$0xf0] %vm679_vm6, %v1162_v31 }
0x1f7a   : > { %v1409_v47 = vpop.permute.xlu1 %1408  ;;  %v1399_v49 = vpop.permute.xlu0 %1398 }
0x1f7b   : > { %1411 = vst.msk [vmem:[#allocation3 - $0x4] sm:$0xf0] %vm679_vm6, %v1409_v47  ;;  %v1401_v50 = vmul.f32 %v1943_v41, %v1399_v49 }
0x1f7d   : > { %1403 = vrot.lane.b32.xlu0 %v1401_v50, %s2127_s15 }
0x1f7e   : > { %v920_v20 = vpop.permute.xlu0 %919 }
0x1f7f   : > { %922 = vst.msk [vmem:[%s2373_s30 + $0x8] sm:$0xf0] %vm679_vm6, %v920_v20 }
0x1fef   : > { %v1404_v42 = vpop.permute.xlu0 %1403 }
0x1ff0   : > { %1406 = vst.msk [vmem:[%s2373_s30 + $0x18] sm:$0xf0] %vm679_vm6, %v1404_v42  ;;  %1407 = vst.msk [vmem:[#allocation2 - $0x4] sm:$0xf0] %vm679_vm6, %v1404_v42 }
0x1ff1   : > { %2043 = shalt.err (!%p2040_p0)
}
0x1ff2   : > { %s2044_s30 = scalar_lea.hbm %s2582_s26, 512  ;;  %s2048_s15 = scalar_lea.hbm %s2641_s5, 1024 }
0x1ff3   : > { %p2045_p4 = scmp.ne.s32.totalorder %s2582_s26, %s2044_s30  ;;  %p2049_p7 = scmp.lt.u32.totalorder %s2582_s26, %s2641_s5 }
0x1ff4   : > { %p2050_p2 = scmp.lt.u32.totalorder %s2048_s15, %s2044_s30  ;;  %p2052_p12 = scmp.lt.u32.totalorder %s2044_s30, %s2582_s26 }
0x1ff5   : > { %p2046_p13 = pnand %p2045_p4, %p2658_p1 }
0x1ff6   : > { %p2051_p8 = por %p2050_p2, %p2049_p7 }
0x1ff7   : > { %p2047_p6 = pneg %p2046_p13 }
0x1ff8   : > { %p2053_p10 = por %p2052_p12, %p2051_p8 }
0x1ffa   : > { %p2054_p3 = pnand %p2053_p10, %p2047_p6 }
0x1ffc   : > { %2057 = shalt.err (!%p2054_p3)
}
0x1ffd   : > { %s2130_s9 = smov 128   ;;  %s2131_s11 = smov 8  }
0x1ffe   : > { %1797 = dma.vmem_to_hbm [thread:$0]  (%p2658_p1), %s2584_s6, 512, %s2582_s26, %s1413_s28, %s2130_s9, %s2130_s9, %s2131_s11  }
0x1fff PF: > { %s1443_s12 = sand.u32 1, %s2096_s18   ;;  %p2659_p5 = scmp.ne.s32.totalorder %s2650_s29, 0 }
0x2000   : > { %p2660_p9 = scmp.ge.s32.totalorder %s2116_s23, 2  ;;  %s1444_s21 = scalar_lea.sflag [#allocation6], %s1443_s12 }
0x2002   : > { %p1811_p11 = pnand %p2660_p9, %p2659_p5 }
0x2004   : > { %2091 = dma.done.wait (!%p1811_p11), %s1444_s21, 512  }
0x2005   : > { %2093 = vsyncadd (!%p1811_p11), %s1444_s21, 4294966784  ;;  %s22_s23 = sadd.s32 1, %s2116_s23   ;;  %s2661_s18 = smov %s2100_s19 }
0x2006   : > { %p19_p0 = scmp.ge.s32.totalorder %s22_s23, 4   ;;  %s2662_s19 = smov %s2104_s20 }
0x2007   : > { %s2663_s20 = smov %s2310_s17  ;;  %s2664_s21 = smov %s2112_s22 }
0x2008   : > { %s2665_s22 = smov %s2667_s8  ;;  %21 = sbr.rel (!%p19_p0) target bundleno = 7 (0x7), region = 97 }
0x200f   :  { %1449 = vsyncpa [#allocation5], 1 }
0x2010   :  { %1451 = vsyncpa [#allocation5 + $0x1], 1 }
0x2011   :  { %1452 = vsyncpa [#allocation8], 1 }
0x2012   :  { %1453 = vsyncpa [#allocation6], 1 }
0x2013   :  { %1455 = vsyncpa [#allocation6 + $0x1], 1 }

</bundles_post_ra>
